<compile_context>
chip_gen: v5e
topology: v5e:2x2
jax: 0.10.0
libtpu: 0.0.40
codegen_flags: <defaults>
</compile_context>

<pallas_src>
import jax
import jax.numpy as jnp
from jax import lax
from jax.experimental import pallas as pl
from jax.experimental.pallas import tpu as pltpu

CLASS_NUM = 20                             # VOC
NUM_ANCHORS = 5                            # len(yolov2_d19_cfg['anchor_size_voc'])
C_FEAT = 1024
OUT_CH = NUM_ANCHORS * (5 + CLASS_NUM)     # 125
OUT_PAD = 128                              # lane-dense padded output channels
COUT_SPLITS = 2                            # split 1024 mid-channels across 2 TCs (v7x)
STRIDE = 32
BN_EPS = 1e-5


# ----------------------------- Pallas kernel --------------------------------
def _pred_head_kernel(patches_ref, w1_ref, scale_ref, shift_ref, w2_ref,
                      out_ref, acc_ref):
    """Grid = (COUT_SPLITS, 9). Axis 1 reduces over the 9 conv taps."""
    k = pl.program_id(1)

    @pl.when(k == 0)
    def _():
        acc_ref[...] = jnp.zeros_like(acc_ref)

    # 3x3 conv tap k, this half of the output channels:
    # (M, Cin) bf16 @ (Cin, Ch) bf16 -> f32 accumulator.
    acc_ref[...] += jnp.dot(patches_ref[0], w1_ref[0, 0],
                            preferred_element_type=jnp.float32)

    @pl.when(k == pl.num_programs(1) - 1)
    def _():
        z = acc_ref[...] * scale_ref[0] + shift_ref[0]   # folded (BN o +bias), eval
        z = jnp.where(z >= 0, z, 0.1 * z)                # LeakyReLU(0.1)
        # Partial 1x1 conv over this half of the intermediate channels
        # (the two halves are summed in the wrapper).
        o = jnp.dot(z.astype(jnp.bfloat16), w2_ref[0],
                    preferred_element_type=jnp.float32)
        out_ref[0] = o.astype(out_ref.dtype)


# ----------------------------- wrapper ---------------------------------------
def _im2col_3x3(feat):
    """feat: (B, h, w, C) NHWC -> taps (9, B*h*w, C), pad=1, tap = ky*3 + kx."""
    B, h, w, C = feat.shape
    pad = jnp.pad(feat, ((0, 0), (1, 1), (1, 1), (0, 0)))
    taps = [pad[:, ky:ky + h, kx:kx + w, :].reshape(B * h * w, C)
            for ky in range(3) for kx in range(3)]
    return jnp.stack(taps, axis=0)


@jax.jit
def pred_head_pallas(feat, w1_hwio, b1, bn_scale, bn_shift, w2, b2):
    """feat: (B, h, w, 1024) NHWC -> (B, h, w, NUM_ANCHORS, 5 + CLASS_NUM)."""
    B, h, w, C = feat.shape
    M = B * h * w
    Ch = C // COUT_SPLITS

    # TODO(synk): for large feature maps (13x13 / 26x26 heads) build the 9 taps
    # in-kernel from a single padded feature map to avoid the 9x activation
    # duplication in HBM; negligible at this toy size, so kept as XLA glue.
    patches = _im2col_3x3(feat).astype(jnp.bfloat16)              # (9, M, C)

    # (3,3,Cin,Cout) -> (COUT_SPLITS, 9, Cin, Ch) bf16.
    w1 = w1_hwio.reshape(9, C, COUT_SPLITS, Ch)
    w1 = jnp.transpose(w1, (2, 0, 1, 3)).astype(jnp.bfloat16)

    # Fold conv bias into the BN affine:  scale*(x + b1) + shift.
    scale = bn_scale.reshape(COUT_SPLITS, 1, Ch)
    shift = (bn_scale * b1 + bn_shift).reshape(COUT_SPLITS, 1, Ch)

    # Pad the 1x1-conv weight 125 -> 128 output lanes; split rows into halves.
    w2_pad = jnp.zeros((C, OUT_PAD), jnp.float32).at[:, :OUT_CH].set(w2)
    w2_split = w2_pad.reshape(COUT_SPLITS, Ch, OUT_PAD).astype(jnp.bfloat16)

    out = pl.pallas_call(
        _pred_head_kernel,
        out_shape=jax.ShapeDtypeStruct((COUT_SPLITS, M, OUT_PAD), jnp.float32),
        grid_spec=pltpu.PrefetchScalarGridSpec(
            num_scalar_prefetch=0,
            grid=(COUT_SPLITS, 9),
            in_specs=[
                pl.BlockSpec((1, M, C),        lambda c, k: (k, 0, 0)),     # patches tap
                pl.BlockSpec((1, 1, C, Ch),    lambda c, k: (c, k, 0, 0)),  # w1 tap half
                pl.BlockSpec((1, 1, Ch),       lambda c, k: (c, 0, 0)),     # BN scale
                pl.BlockSpec((1, 1, Ch),       lambda c, k: (c, 0, 0)),     # BN shift
                pl.BlockSpec((1, Ch, OUT_PAD), lambda c, k: (c, 0, 0)),     # w2 half
            ],
            out_specs=pl.BlockSpec((1, M, OUT_PAD), lambda c, k: (c, 0, 0)),
            scratch_shapes=[pltpu.VMEM((M, Ch), jnp.float32)],
        ),
        compiler_params=pltpu.CompilerParams(
            dimension_semantics=("parallel", "arbitrary")),
    )(patches, w1, scale, shift, w2_split)

    # Sum the two channel-half partial products, add 1x1 bias, strip lane pad.
    pred = out.sum(axis=0)[:, :OUT_CH] + b2
    # PyTorch: pred.permute(0,2,3,1).view(B, h, w, A, 5+CLASS_NUM)
    return pred.reshape(B, h, w, NUM_ANCHORS, 5 + CLASS_NUM)


# ----------------------------- glue / model ---------------------------------
def backbone_stub(x_nchw, proj_w):
    """Deterministic stand-in for Darknet-19 'layer3': stride-32, 1024 channels."""
    B, C, H, W = x_nchw.shape
    s = STRIDE
    x = jnp.transpose(x_nchw, (0, 2, 3, 1))                      # NHWC
    x = x.reshape(B, H // s, s, W // s, s, C)
    x = jnp.transpose(x, (0, 1, 3, 2, 4, 5)).reshape(B, H // s, W // s, s * s * C)
    return jnp.dot(x, proj_w)                                    # (B, h, w, 1024) NHWC


def ref_pred_head(feat, w1_hwio, b1, bn_scale, bn_shift, w2, b2):
    """Plain-JAX f32 reference of the pred_head (for correctness check)."""
    conv = lax.conv_general_dilated(
        feat, w1_hwio, window_strides=(1, 1), padding='SAME',
        dimension_numbers=('NHWC', 'HWIO', 'NHWC'))
    z = conv + b1
    z = z * bn_scale + bn_shift
    z = jnp.where(z >= 0, z, 0.1 * z)
    out = jnp.einsum('bhwc,cd->bhwd', z, w2) + b2
    B, h, w, _ = out.shape
    return out.reshape(B, h, w, NUM_ANCHORS, 5 + CLASS_NUM)


def init_params(key):
    k1, k2, k3, k4, k5, k6, k7 = jax.random.split(key, 7)
    C = C_FEAT
    fan1 = 3 * 3 * C
    params = dict(
        w1=jax.random.normal(k1, (3, 3, C, C), jnp.float32) / jnp.sqrt(fan1),
        b1=0.01 * jax.random.normal(k2, (C,), jnp.float32),
        gamma=1.0 + 0.1 * jax.random.normal(k3, (C,), jnp.float32),
        beta=0.1 * jax.random.normal(k4, (C,), jnp.float32),
        w2=jax.random.normal(k5, (C, OUT_CH), jnp.float32) / jnp.sqrt(C),
        b2=0.01 * jax.random.normal(k6, (OUT_CH,), jnp.float32),
        proj_w=jax.random.normal(k7, (3 * STRIDE * STRIDE, C), jnp.float32)
        / jnp.sqrt(3 * STRIDE * STRIDE),
    )
    # Fold BN (eval mode, running_mean=0, running_var=1).
    params["bn_scale"] = params["gamma"] / jnp.sqrt(1.0 + BN_EPS)
    params["bn_shift"] = params["beta"]
    return params


def yolo_forward(x_nchw, params):
    feat = backbone_stub(x_nchw, params["proj_w"])
    return pred_head_pallas(feat, params["w1"], params["b1"],
                            params["bn_scale"], params["bn_shift"],
                            params["w2"], params["b2"])


if __name__ == "__main__":
    key = jax.random.PRNGKey(0)
    kx, kp = jax.random.split(key)
    params = init_params(kp)

    # x : [batch, 3, H, W]  (PyTorch NCHW convention), H=W=128 -> 4x4 feature grid
    x = jax.random.normal(kx, (2, 3, 128, 128), jnp.float32)

    pred = yolo_forward(x, params)
    pred = jax.block_until_ready(pred)

    # Sanity check against a plain-JAX f32 reference of the pred_head.
    feat = backbone_stub(x, params["proj_w"])
    ref = ref_pred_head(feat, params["w1"], params["b1"],
                        params["bn_scale"], params["bn_shift"],
                        params["w2"], params["b2"])
    ref = jax.block_until_ready(ref)

    assert pred.shape == (2, 4, 4, NUM_ANCHORS, 5 + CLASS_NUM), pred.shape
    assert jnp.isfinite(pred).all()
    err = jnp.max(jnp.abs(pred - ref))
    # bf16 inputs with f32 accumulation vs pure-f32 reference.
    assert err < 4e-2, f"max abs err too large vs f32 reference: {err}"

    print("KERNEL_OK")
</pallas_src>

<mosaic_0001>
module attributes {stable_mosaic.version = 11 : i64} {
  func.func @_pred_head_kernel(%arg0: i32, %arg1: i32, %arg2: memref<1x32x1024xbf16, #tpu.memory_space<vmem>>, %arg3: memref<1x1x1024x512xbf16, #tpu.memory_space<vmem>>, %arg4: memref<1x1x512xf32, #tpu.memory_space<vmem>>, %arg5: memref<1x1x512xf32, #tpu.memory_space<vmem>>, %arg6: memref<1x512x128xbf16, #tpu.memory_space<vmem>>, %arg7: memref<1x32x128xf32, #tpu.memory_space<vmem>>, %arg8: memref<32x512xf32, #tpu.memory_space<vmem>>) attributes {dimension_semantics = [#tpu.dimension_semantics<parallel>, #tpu.dimension_semantics<arbitrary>], iteration_bounds = array<i64: 2, 9>, scalar_prefetch = 0 : i64, scratch_operands = 1 : i64, tpu.core_type = #tpu.core_type<tc>, window_params = [{transform_indices = @transform_0, window_bounds = array<i64: 1, 32, 1024>}, {transform_indices = @transform_1, window_bounds = array<i64: 1, 1, 1024, 512>}, {transform_indices = @transform_2, window_bounds = array<i64: 1, 1, 512>}, {transform_indices = @transform_3, window_bounds = array<i64: 1, 1, 512>}, {transform_indices = @transform_4, window_bounds = array<i64: 1, 512, 128>}, {transform_indices = @transform_5, window_bounds = array<i64: 1, 32, 128>}]} {
    %c0_i32 = arith.constant 0 : i32
    %0 = arith.cmpi eq, %arg1, %c0_i32 : i32
    %1 = arith.extui %0 : i1 to i32
    %c0_i32_0 = arith.constant 0 : i32
    %2 = arith.cmpi ne, %1, %c0_i32_0 : i32
    scf.if %2 {
      %cst_12 = arith.constant 0.000000e+00 : f32
      %14 = vector.broadcast %cst_12 : f32 to vector<32x512xf32>
      %c0_13 = arith.constant 0 : index
      %c0_14 = arith.constant 0 : index
      %15 = vector.load %arg8[%c0_13, %c0_14] : memref<32x512xf32, #tpu.memory_space<vmem>>, vector<32x512xf32>
      tpu.vector_store %arg8[%c0_13, %c0_14], %14 {strides = array<i32>} : memref<32x512xf32, #tpu.memory_space<vmem>>, vector<32x512xf32>,
    } else {
    }
    %c0 = arith.constant 0 : index
    %c0_1 = arith.constant 0 : index
    %3 = vector.load %arg8[%c0, %c0_1] : memref<32x512xf32, #tpu.memory_space<vmem>>, vector<32x512xf32>
    %c0_2 = arith.constant 0 : index
    %c0_3 = arith.constant 0 : index
    %c0_4 = arith.constant 0 : index
    %4 = vector.load %arg2[%c0_2, %c0_3, %c0_4] : memref<1x32x1024xbf16, #tpu.memory_space<vmem>>, vector<1x32x1024xbf16>
    %5 = vector.shape_cast %4 : vector<1x32x1024xbf16> to vector<32x1024xbf16>
    %c0_5 = arith.constant 0 : index
    %c0_6 = arith.constant 0 : index
    %c0_7 = arith.constant 0 : index
    %c0_8 = arith.constant 0 : index
    %6 = vector.load %arg3[%c0_5, %c0_6, %c0_7, %c0_8] : memref<1x1x1024x512xbf16, #tpu.memory_space<vmem>>, vector<1x1x1024x512xbf16>
    %7 = vector.shape_cast %6 : vector<1x1x1024x512xbf16> to vector<1024x512xbf16>
    %cst = arith.constant dense<0.000000e+00> : vector<32x512xf32>
    %8 = tpu.matmul %5, %7, %cst {dimension_numbers = #tpu.dot_dimension_numbers<[1], [0], [0], [1], [0, 0, 1, 1], [], []>} : vector<32x1024xbf16>, vector<1024x512xbf16>, vector<32x512xf32> -> vector<32x512xf32>
    %9 = arith.addf %3, %8 : vector<32x512xf32>
    %c0_9 = arith.constant 0 : index
    %c0_10 = arith.constant 0 : index
    %10 = vector.load %arg8[%c0_9, %c0_10] : memref<32x512xf32, #tpu.memory_space<vmem>>, vector<32x512xf32>
    tpu.vector_store %arg8[%c0_9, %c0_10], %9 {strides = array<i32>} : memref<32x512xf32, #tpu.memory_space<vmem>>, vector<32x512xf32>,
    %c8_i32 = arith.constant 8 : i32
    %11 = arith.cmpi eq, %arg1, %c8_i32 : i32
    %12 = arith.extui %11 : i1 to i32
    %c0_i32_11 = arith.constant 0 : i32
    %13 = arith.cmpi ne, %12, %c0_i32_11 : i32
    scf.if %13 {
      %c0_12 = arith.constant 0 : index
      %c0_13 = arith.constant 0 : index
      %14 = vector.load %arg8[%c0_12, %c0_13] : memref<32x512xf32, #tpu.memory_space<vmem>>, vector<32x512xf32>
      %c0_14 = arith.constant 0 : index
      %c0_15 = arith.constant 0 : index
      %c0_16 = arith.constant 0 : index
      %15 = vector.load %arg4[%c0_14, %c0_15, %c0_16] : memref<1x1x512xf32, #tpu.memory_space<vmem>>, vector<1x1x512xf32>
      %16 = vector.shape_cast %15 : vector<1x1x512xf32> to vector<1x512xf32>
      %17 = vector.broadcast %16 : vector<1x512xf32> to vector<32x512xf32>
      %18 = arith.mulf %14, %17 : vector<32x512xf32>
      %c0_17 = arith.constant 0 : index
      %c0_18 = arith.constant 0 : index
      %c0_19 = arith.constant 0 : index
      %19 = vector.load %arg5[%c0_17, %c0_18, %c0_19] : memref<1x1x512xf32, #tpu.memory_space<vmem>>, vector<1x1x512xf32>
      %20 = vector.shape_cast %19 : vector<1x1x512xf32> to vector<1x512xf32>
      %21 = vector.broadcast %20 : vector<1x512xf32> to vector<32x512xf32>
      %22 = arith.addf %18, %21 : vector<32x512xf32>
      %cst_20 = arith.constant 0.000000e+00 : f32
      %23 = vector.broadcast %cst_20 : f32 to vector<32x512xf32>
      %24 = arith.cmpf oge, %22, %23 : vector<32x512xf32>
      %cst_21 = arith.constant 1.000000e-01 : f32
      %25 = vector.broadcast %cst_21 : f32 to vector<32x512xf32>
      %26 = arith.mulf %25, %22 : vector<32x512xf32>
      %27 = arith.select %24, %22, %26 : vector<32x512xi1>, vector<32x512xf32>
      %28 = arith.truncf %27 : vector<32x512xf32> to vector<32x512xbf16>
      %c0_22 = arith.constant 0 : index
      %c0_23 = arith.constant 0 : index
      %c0_24 = arith.constant 0 : index
      %29 = vector.load %arg6[%c0_22, %c0_23, %c0_24] : memref<1x512x128xbf16, #tpu.memory_space<vmem>>, vector<1x512x128xbf16>
      %30 = vector.shape_cast %29 : vector<1x512x128xbf16> to vector<512x128xbf16>
      %cst_25 = arith.constant dense<0.000000e+00> : vector<32x128xf32>
      %31 = tpu.matmul %28, %30, %cst_25 {dimension_numbers = #tpu.dot_dimension_numbers<[1], [0], [0], [1], [0, 0, 1, 1], [], []>} : vector<32x512xbf16>, vector<512x128xbf16>, vector<32x128xf32> -> vector<32x128xf32>
      %c0_26 = arith.constant 0 : index
      %c0_27 = arith.constant 0 : index
      %c0_28 = arith.constant 0 : index
      %32 = vector.load %arg7[%c0_26, %c0_27, %c0_28] : memref<1x32x128xf32, #tpu.memory_space<vmem>>, vector<1x32x128xf32>
      %33 = vector.shape_cast %32 : vector<1x32x128xf32> to vector<32x128xf32>
      %34 = vector.shape_cast %31 : vector<32x128xf32> to vector<1x32x128xf32>
      tpu.vector_store %arg7[%c0_26, %c0_27, %c0_28], %34 {strides = array<i32>} : memref<1x32x128xf32, #tpu.memory_space<vmem>>, vector<1x32x128xf32>,
    } else {
    }
    return
  }
  func.func @transform_0(%arg0: i32, %arg1: i32) -> (i32, i32, i32) {
    %c0_i32 = arith.constant 0 : i32
    %c0_i32_0 = arith.constant 0 : i32
    %c0_i32_1 = arith.constant 0 : i32
    return %arg1, %c0_i32, %c0_i32_0 : i32, i32, i32
  }
  func.func @transform_1(%arg0: i32, %arg1: i32) -> (i32, i32, i32, i32) {
    %c0_i32 = arith.constant 0 : i32
    %c0_i32_0 = arith.constant 0 : i32
    %c0_i32_1 = arith.constant 0 : i32
    return %arg0, %arg1, %c0_i32, %c0_i32_0 : i32, i32, i32, i32
  }
  func.func @transform_2(%arg0: i32, %arg1: i32) -> (i32, i32, i32) {
    %c0_i32 = arith.constant 0 : i32
    %c0_i32_0 = arith.constant 0 : i32
    %c0_i32_1 = arith.constant 0 : i32
    return %arg0, %c0_i32, %c0_i32_0 : i32, i32, i32
  }
  func.func @transform_3(%arg0: i32, %arg1: i32) -> (i32, i32, i32) {
    %c0_i32 = arith.constant 0 : i32
    %c0_i32_0 = arith.constant 0 : i32
    %c0_i32_1 = arith.constant 0 : i32
    return %arg0, %c0_i32, %c0_i32_0 : i32, i32, i32
  }
  func.func @transform_4(%arg0: i32, %arg1: i32) -> (i32, i32, i32) {
    %c0_i32 = arith.constant 0 : i32
    %c0_i32_0 = arith.constant 0 : i32
    %c0_i32_1 = arith.constant 0 : i32
    return %arg0, %c0_i32, %c0_i32_0 : i32, i32, i32
  }
  func.func @transform_5(%arg0: i32, %arg1: i32) -> (i32, i32, i32) {
    %c0_i32 = arith.constant 0 : i32
    %c0_i32_0 = arith.constant 0 : i32
    %c0_i32_1 = arith.constant 0 : i32
    return %arg0, %c0_i32, %c0_i32_0 : i32, i32, i32
  }
}

</mosaic_0001>

<bundles_post_ra>
// kernel: pred_head_pallas.1
= control target key start
LH: loop header
LB: loop body
LE: loop exit
PB: predicated region body
PF: predicated region fallthrough
CT: control target
= control target key end

     0   :  { %s4875_s18 = smov 0   ;;  %s4877_s19 = smov 0   ;;  %s5758_s0 = inlined_call_operand.vmem [shape: bf16[9,32,1024], index: 0, kind: input, shape index: {}]   ;;  %s5759_s1 = inlined_call_operand.vmem [shape: bf16[2,9,1024,512], index: 1, kind: input, shape index: {}]   ;;  %s5760_s2 = inlined_call_operand.vmem [shape: f32[2,1,512], index: 2, kind: input, shape index: {}]   ;;  %s5761_s3 = inlined_call_operand.vmem [shape: f32[2,1,512], index: 3, kind: input, shape index: {}]   ;;  %s5762_s4 = inlined_call_operand.vmem [shape: bf16[2,512,128], index: 4, kind: input, shape index: {}]   ;;  %s5763_s5 = inlined_call_operand.vmem [shape: f32[2,32,128], index: 5, kind: output, shape index: {}]  }
   0x1   :  { %s4879_s20 = smov 0   ;;  %s4881_s21 = smov 0  }
   0x2   :  { %s4883_s22 = smov 0  }
   0x3 LB: > { %s24_s23 = sadd.s32 1, %s4834_s20  ;;  %s27_s24 = sadd.s32 1, %s4838_s21  ;;  %s4842_s22 = sphi %s4883_s22, %s15_s22   ;;  %s4838_s21 = sphi %s4881_s21, %s5767_s21   ;;  %s4834_s20 = sphi %s4879_s20, %s5766_s20   ;;  %s4830_s19 = sphi %s4877_s19, %s5765_s19   ;;  %s4826_s18 = sphi %s4875_s18, %s5764_s18  }
   0x4   : > { %p25_p0 = scmp.ge.s32.totalorder %s24_s23, 9  ;;  %p3224_p1 = scmp.ge.s32.totalorder %s4842_s22, 1 }
   0x5   : > { %p243_p2 = scmp.lt.s32.totalorder %s4842_s22, 19 }
   0x6   : > { %s5769_s23 = smov (%p25_p0, %s24_s23), 0  ;;  %s5771_s24 = smov (!%p25_p0, %s27_s24), %s4838_s21 }
   0x7   : > { %p244_p3 = pnand %p3224_p1, %p243_p2  ;;  %p29_p4 = scmp.ge.s32.totalorder %s5771_s24, 2 }
   0x8   : > { %p293_p5 = scmp.lt.s32.totalorder (!%p244_p3), %s4826_s18, 8  ;;  %p298_p6 = scmp.lt.s32.totalorder (!%p244_p3), %s4830_s19, 1 }
   0x9   : > { %s5773_s24 = smov (%p29_p4, %s5771_s24), 0  ;;  %247 = sbr.rel (%p244_p3) target bundleno = 667 (0x29b), region = 40 }
   0xa   : > { %p3235_p7 = scmp.ne.s32.totalorder (!%p244_p3), %s4826_s18, 0 }
   0xe   : > { %s294_s25 = scalar_select %p293_p5, %s4826_s18, 8 }
   0xf   : > { %s5775_s19 = smov (!%p298_p6, %s4830_s19), 1 }
  0x10   : > { %s4455_s26 = sshll.u32 %s294_s25, 7  ;;  %s3227_s27 = sshll.u32 %s294_s25, 9 }
  0x11   : > { %s4912_s30 = scalar_lea.vmem %s5758_s0, %s4455_s26  ;;  %s4762_s6 = smul.u32 4608, %s5775_s19 }
  0x12   : > { %s3229_s7 = sshll.u32 %s5775_s19, 2  ;;  %s4456_s8 = sshll.u32 %s5775_s19, 8 }
  0x13   : > { %s304_s9 = sadd.s32 %s4762_s6, %s3227_s27  ;;  %s4917_s12 = scalar_lea.vmem %s5760_s2, %s3229_s7 }
  0x14   : > { %s3228_s13 = sshll.u32 %s304_s9, 2  ;;  %s4922_s16 = scalar_lea.vmem %s5761_s3, %s3229_s7 }
  0x15   : > { %s4927_s26 = scalar_lea.vmem %s5759_s1, %s3228_s13  ;;  %s4932_s27 = scalar_lea.vmem %s5762_s4, %s4456_s8 }
  0x16   : > { %s4457_s6 = sshll.u32 %s5775_s19, 5  ;;  %328 = sbr.rel (%p3235_p7) target bundleno = 44 (0x2c), region = 44 }
  0x17   : > { %s4937_s9 = scalar_lea.vmem %s5763_s5, %s4457_s6 }
  0x1b   : > { %v4844_v0 = vmov 0.0  }
  0x1c   : > { %329 = vst [vmem:[#allocation2 + $0x30] sm:$0xff] %v4844_v0 }
  0x1d   : > { %330 = vst [vmem:[#allocation2] sm:$0xff] %v4844_v0 }
  0x1e   : > { %331 = vst [vmem:[#allocation2 + $0x58] sm:$0xff] %v4844_v0 }
  0x1f   : > { %332 = vst [vmem:[#allocation2 + $0x18] sm:$0xff] %v4844_v0 }
  0x20   : > { %333 = vst [vmem:[#allocation2 + $0x50] sm:$0xff] %v4844_v0 }
  0x21   : > { %334 = vst [vmem:[#allocation2 + $0x68] sm:$0xff] %v4844_v0 }
  0x22   : > { %335 = vst [vmem:[#allocation2 + $0x8] sm:$0xff] %v4844_v0 }
  0x23   : > { %336 = vst [vmem:[#allocation2 + $0x48] sm:$0xff] %v4844_v0 }
  0x24   : > { %337 = vst [vmem:[#allocation2 + $0x40] sm:$0xff] %v4844_v0 }
  0x25   : > { %338 = vst [vmem:[#allocation2 + $0x20] sm:$0xff] %v4844_v0 }
  0x26   : > { %339 = vst [vmem:[#allocation2 + $0x10] sm:$0xff] %v4844_v0 }
  0x27   : > { %340 = vst [vmem:[#allocation2 + $0x38] sm:$0xff] %v4844_v0 }
  0x28   : > { %341 = vst [vmem:[#allocation2 + $0x60] sm:$0xff] %v4844_v0 }
  0x29   : > { %342 = vst [vmem:[#allocation2 + $0x70] sm:$0xff] %v4844_v0 }
  0x2a   : > { %343 = vst [vmem:[#allocation2 + $0x78] sm:$0xff] %v4844_v0 }
  0x2b   : > { %344 = vst [vmem:[#allocation2 + $0x28] sm:$0xff] %v4844_v0 }
  0x2c PF: > { %v3414_v1 = vld [vmem:[%s4927_s26 + $0xe0] sm:$0xf]  ;;  %v4504_v2 = vld [vmem:[%s4927_s26 + $0xec] sm:$0xf0]  ;;  %p4324_p8 = scmp.ne.s32.totalorder %s4826_s18, 8 }
  0x2d   : > { %v3542_v3 = vld [vmem:[%s4927_s26 + $0x1e0] sm:$0xf]  ;;  %v3415_v4 = vor.u32 %v4504_v2, %v3414_v1  ;;  %v4536_v5 = vld [vmem:[%s4927_s26 + $0x1ec] sm:$0xf0] }
  0x2e   : > { %v3670_v6 = vld [vmem:[%s4927_s26 + $0x2e0] sm:$0xf]  ;;  %v4568_v7 = vld [vmem:[%s4927_s26 + $0x2ec] sm:$0xf0]  ;;  %v3543_v8 = vor.u32 %v4536_v5, %v3542_v3 }
  0x2f   : > { %v3671_v9 = vor.u32 %v4568_v7, %v3670_v6  ;;  %v3798_v10 = vld [vmem:[%s4927_s26 + $0x3e0] sm:$0xf]  ;;  %v4600_v11 = vld [vmem:[%s4927_s26 + $0x3ec] sm:$0xf0]  ;;  %1993 = vmatpush.bf16.msra.mxu0 %v3415_v4 }
  0x30   : > { %v3398_v12 = vld [vmem:[%s4927_s26 + $0xc0] sm:$0xf]  ;;  %v3799_v13 = vor.u32 %v4600_v11, %v3798_v10  ;;  %v4500_v14 = vld [vmem:[%s4927_s26 + $0xcc] sm:$0xf0]  ;;  %2012 = vmatpush.bf16.msra.mxu1 %v3543_v8 }
  0x31   : > { %v3526_v15 = vld [vmem:[%s4927_s26 + $0x1c0] sm:$0xf]  ;;  %v4532_v16 = vld [vmem:[%s4927_s26 + $0x1cc] sm:$0xf0]  ;;  %2031 = vmatpush.bf16.msra.mxu2 %v3671_v9  ;;  %v3399_v17 = vor.u32 %v4500_v14, %v3398_v12 }
  0x32   : > { %v3527_v18 = vor.u32 %v4532_v16, %v3526_v15  ;;  %v3654_v19 = vld [vmem:[%s4927_s26 + $0x2c0] sm:$0xf]  ;;  %v4564_v20 = vld [vmem:[%s4927_s26 + $0x2cc] sm:$0xf0]  ;;  %2050 = vmatpush.bf16.msra.mxu3 %v3799_v13 }
  0x33   : > { %v3782_v21 = vld [vmem:[%s4927_s26 + $0x3c0] sm:$0xf]  ;;  %v3655_v22 = vor.u32 %v4564_v20, %v3654_v19  ;;  %v4596_v23 = vld [vmem:[%s4927_s26 + $0x3cc] sm:$0xf0]  ;;  %1994 = vmatpush.bf16.msra.mxu0 %v3399_v17 }
  0x34   : > { %v3382_v24 = vld [vmem:[%s4927_s26 + $0xa0] sm:$0xf]  ;;  %v4496_v25 = vld [vmem:[%s4927_s26 + $0xac] sm:$0xf0]  ;;  %v3783_v26 = vor.u32 %v4596_v23, %v3782_v21  ;;  %2013 = vmatpush.bf16.msra.mxu1 %v3527_v18 }
  0x35   : > { %v3510_v27 = vld [vmem:[%s4927_s26 + $0x1a0] sm:$0xf]  ;;  %v4528_v28 = vld [vmem:[%s4927_s26 + $0x1ac] sm:$0xf0]  ;;  %v3383_v30 = vor.u32 %v4496_v25, %v3382_v24  ;;  %2032 = vmatpush.bf16.msra.mxu2 %v3655_v22 }
  0x36   : > { %v3638_v29 = vld [vmem:[%s4927_s26 + $0x2a0] sm:$0xf]  ;;  %v4560_v31 = vld [vmem:[%s4927_s26 + $0x2ac] sm:$0xf0]  ;;  %v3511_v34 = vor.u32 %v4528_v28, %v3510_v27  ;;  %2051 = vmatpush.bf16.msra.mxu3 %v3783_v26 }
  0x37   : > { %v3766_v32 = vld [vmem:[%s4927_s26 + $0x3a0] sm:$0xf]  ;;  %v4592_v33 = vld [vmem:[%s4927_s26 + $0x3ac] sm:$0xf0]  ;;  %v3639_v35 = vor.u32 %v4560_v31, %v3638_v29  ;;  %1995 = vmatpush.bf16.msra.mxu0 %v3383_v30  ;;  %v4458_v31 = vld [vmem:[%s4912_s30 + $0x4] sm:$0xf] }
  0x38   : > { %v3366_v36 = vld [vmem:[%s4927_s26 + $0x80] sm:$0xf]  ;;  %v4492_v37 = vld [vmem:[%s4927_s26 + $0x8c] sm:$0xf0]  ;;  %v3767_v39 = vor.u32 %v4592_v33, %v3766_v32  ;;  %2014 = vmatpush.bf16.msra.mxu1 %v3511_v34  ;;  %v3240_v32 = vld [vmem:[%s4912_s30 + $0x20] sm:$0xf0] }
  0x39   : > { %v3494_v38 = vld [vmem:[%s4927_s26 + $0x180] sm:$0xf]  ;;  %v4524_v40 = vld [vmem:[%s4927_s26 + $0x18c] sm:$0xf0]  ;;  %v3367_v45 = vor.u32 %v4492_v37, %v3366_v36  ;;  %2033 = vmatpush.bf16.msra.mxu2 %v3639_v35  ;;  %v3246_v36 = vld [vmem:[%s4912_s30 + $0x8] sm:$0xf] }
  0x3a   : > { %v3622_v41 = vld [vmem:[%s4927_s26 + $0x280] sm:$0xf]  ;;  %v4556_v42 = vld [vmem:[%s4927_s26 + $0x28c] sm:$0xf0]  ;;  %v3495_v46 = vor.u32 %v4524_v40, %v3494_v38  ;;  %2052 = vmatpush.bf16.msra.mxu3 %v3767_v39 }
  0x3b   : > { %v3750_v43 = vld [vmem:[%s4927_s26 + $0x380] sm:$0xf]  ;;  %v4588_v44 = vld [vmem:[%s4927_s26 + $0x38c] sm:$0xf0]  ;;  %v3623_v47 = vor.u32 %v4556_v42, %v3622_v41  ;;  %1996 = vmatpush.bf16.msra.mxu0 %v3367_v45  ;;  %v4463_v41 = vld [vmem:[%s4912_s30 + $0x24] sm:$0xf0] }
  0x3c   : > { %v3350_v48 = vld [vmem:[%s4927_s26 + $0x60] sm:$0xf]  ;;  %v4488_v49 = vld [vmem:[%s4927_s26 + $0x6c] sm:$0xf0]  ;;  %v3751_v51 = vor.u32 %v4588_v44, %v3750_v43  ;;  %2015 = vmatpush.bf16.msra.mxu1 %v3495_v46  ;;  %v4459_v42 = vld [vmem:[%s4912_s30 + $0xc] sm:$0xf] }
  0x3d   : > { %v3478_v50 = vld [vmem:[%s4927_s26 + $0x160] sm:$0xf]  ;;  %v4520_v52 = vld [vmem:[%s4927_s26 + $0x16c] sm:$0xf0]  ;;  %v3351_v57 = vor.u32 %v4488_v49, %v3350_v48  ;;  %2034 = vmatpush.bf16.msra.mxu2 %v3623_v47  ;;  %v3248_v43 = vld [vmem:[%s4912_s30 + $0x28] sm:$0xf0] }
  0x3e   : > { %v3606_v53 = vld [vmem:[%s4927_s26 + $0x260] sm:$0xf]  ;;  %v4552_v54 = vld [vmem:[%s4927_s26 + $0x26c] sm:$0xf0]  ;;  %v3479_v58 = vor.u32 %v4520_v52, %v3478_v50  ;;  %2053 = vmatpush.bf16.msra.mxu3 %v3751_v51 }
  0x3f   : > { %v3734_v55 = vld [vmem:[%s4927_s26 + $0x360] sm:$0xf]  ;;  %v4584_v56 = vld [vmem:[%s4927_s26 + $0x36c] sm:$0xf0]  ;;  %v3607_v59 = vor.u32 %v4552_v54, %v3606_v53  ;;  %1997 = vmatpush.bf16.msra.mxu0 %v3351_v57  ;;  %v5024_v54 = vor.u32 %v4458_v31, %v3240_v32 }
  0x40   : > { %v3334_v60 = vld [vmem:[%s4927_s26 + $0x40] sm:$0xf]  ;;  %v4484_v61 = vld [vmem:[%s4927_s26 + $0x4c] sm:$0xf0]  ;;  %v3735_v63 = vor.u32 %v4584_v56, %v3734_v55  ;;  %2016 = vmatpush.bf16.msra.mxu1 %v3479_v58  ;;  %v5026_v55 = vor.u32 %v4463_v41, %v3246_v36  ;;  %v5030_v58 = vor.u32 %v4459_v42, %v3248_v43 }
  0x41   : > { %v3462_v62 = vld [vmem:[%s4927_s26 + $0x140] sm:$0xf]  ;;  %v4516_v0 = vld [vmem:[%s4927_s26 + $0x14c] sm:$0xf0]  ;;  %v3335_v5 = vor.u32 %v4484_v61, %v3334_v60  ;;  %2035 = vmatpush.bf16.msra.mxu2 %v3607_v59 }
  0x42   : > { %v3590_v1 = vld [vmem:[%s4927_s26 + $0x240] sm:$0xf]  ;;  %v4548_v2 = vld [vmem:[%s4927_s26 + $0x24c] sm:$0xf0]  ;;  %v3463_v6 = vor.u32 %v4516_v0, %v3462_v62  ;;  %2054 = vmatpush.bf16.msra.mxu3 %v3735_v63 }
  0x43   : > { %v3718_v3 = vld [vmem:[%s4927_s26 + $0x340] sm:$0xf]  ;;  %v4580_v4 = vld [vmem:[%s4927_s26 + $0x34c] sm:$0xf0]  ;;  %v3591_v7 = vor.u32 %v4548_v2, %v3590_v1  ;;  %1998 = vmatpush.bf16.msra.mxu0 %v3335_v5 }
  0x44   : > { %v3318_v8 = vld [vmem:[%s4927_s26 + $0x20] sm:$0xf]  ;;  %v4480_v9 = vld [vmem:[%s4927_s26 + $0x2c] sm:$0xf0]  ;;  %v3719_v11 = vor.u32 %v4580_v4, %v3718_v3  ;;  %2017 = vmatpush.bf16.msra.mxu1 %v3463_v6 }
  0x45   : > { %v3446_v10 = vld [vmem:[%s4927_s26 + $0x120] sm:$0xf]  ;;  %v4512_v12 = vld [vmem:[%s4927_s26 + $0x12c] sm:$0xf0]  ;;  %v3319_v18 = vor.u32 %v4480_v9, %v3318_v8  ;;  %2036 = vmatpush.bf16.msra.mxu2 %v3591_v7 }
  0x46   : > { %v3574_v13 = vld [vmem:[%s4927_s26 + $0x220] sm:$0xf]  ;;  %v4544_v14 = vld [vmem:[%s4927_s26 + $0x22c] sm:$0xf0]  ;;  %v3447_v22 = vor.u32 %v4512_v12, %v3446_v10  ;;  %2055 = vmatpush.bf16.msra.mxu3 %v3719_v11 }
  0x47   : > { %v3702_v15 = vld [vmem:[%s4927_s26 + $0x320] sm:$0xf]  ;;  %v4576_v16 = vld [vmem:[%s4927_s26 + $0x32c] sm:$0xf0]  ;;  %v3575_v23 = vor.u32 %v4544_v14, %v3574_v13  ;;  %1999 = vmatpush.bf16.msra.mxu0 %v3319_v18 }
  0x48   : > { %v3302_v17 = vld [vmem:[%s4927_s26] sm:$0xf]  ;;  %v4476_v19 = vld [vmem:[%s4927_s26 + $0xc] sm:$0xf0]  ;;  %v3703_v27 = vor.u32 %v4576_v16, %v3702_v15  ;;  %2018 = vmatpush.bf16.msra.mxu1 %v3447_v22 }
  0x49   : > { %v3430_v20 = vld [vmem:[%s4927_s26 + $0x100] sm:$0xf]  ;;  %v4508_v21 = vld [vmem:[%s4927_s26 + $0x10c] sm:$0xf0]  ;;  %v3303_v35 = vor.u32 %v4476_v19, %v3302_v17  ;;  %2037 = vmatpush.bf16.msra.mxu2 %v3575_v23 }
  0x4a   : > { %v3558_v24 = vld [vmem:[%s4927_s26 + $0x200] sm:$0xf]  ;;  %v4540_v25 = vld [vmem:[%s4927_s26 + $0x20c] sm:$0xf0]  ;;  %v3431_v39 = vor.u32 %v4508_v21, %v3430_v20  ;;  %2056 = vmatpush.bf16.msra.mxu3 %v3703_v27 }
  0x4b   : > { %v3686_v26 = vld [vmem:[%s4927_s26 + $0x300] sm:$0xf]  ;;  %v4572_v28 = vld [vmem:[%s4927_s26 + $0x30c] sm:$0xf0]  ;;  %v3559_v40 = vor.u32 %v4540_v25, %v3558_v24  ;;  %2000 = vmatpush.bf16.msra.mxu0 %v3303_v35 }
  0x4c   : > { %v3238_v29 = vld [vmem:[%s4912_s30] sm:$0xf]  ;;  %v4696_v34 = vld [vmem:[%s4927_s26 + $0x6ec] sm:$0xf0]  ;;  %v3687_v44 = vor.u32 %v4572_v28, %v3686_v26  ;;  %2019 = vmatpush.bf16.msra.mxu1 %v3431_v39  ;;  %v3280_v39 = vld [vmem:[%s4912_s30 + $0x68] sm:$0xf0] }
  0x4d   : > { %v4462_v30 = vld [vmem:[%s4912_s30 + $0x1c] sm:$0xf0]  ;;  %v4664_v38 = vld [vmem:[%s4927_s26 + $0x5ec] sm:$0xf0]  ;;  %2038 = vmatpush.bf16.msra.mxu2 %v3559_v40 }
  0x4e   : > { %v4182_v33 = vld [vmem:[%s4927_s26 + $0x6e0] sm:$0xf]  ;;  %v4632_v47 = vld [vmem:[%s4927_s26 + $0x4ec] sm:$0xf0]  ;;  %v5019_v49 = vor.u32 %v4462_v30, %v3238_v29  ;;  %2057 = vmatpush.bf16.msra.mxu3 %v3687_v44  ;;  %v4466_v29 = vld [vmem:[%s4912_s30 + $0x44] sm:$0xf] }
  0x4f   : > { %v4054_v37 = vld [vmem:[%s4927_s26 + $0x5e0] sm:$0xf]  ;;  %v4183_v45 = vor.u32 %v4696_v34, %v4182_v33  ;;  %v4728_v51 = vld [vmem:[%s4927_s26 + $0x7ec] sm:$0xf0]  ;;  %2020 = vmatmul.bf16.vlgmr.msra.gmra.mxu1 %v5024_v54  ;;  %v3272_v30 = vld [vmem:[%s4912_s30 + $0x60] sm:$0xf0] }
  0x50   : > { %v3926_v46 = vld [vmem:[%s4927_s26 + $0x4e0] sm:$0xf]  ;;  %v4055_v50 = vor.u32 %v4664_v38, %v4054_v37  ;;  %v4692_v53 = vld [vmem:[%s4927_s26 + $0x6cc] sm:$0xf0]  ;;  %2001 = vmatmul.bf16.vlgmr.msra.gmra.mxu0 %v5019_v49  ;;  %2039 = vmatmul.bf16.vlgmr.msra.gmra.mxu2 %v5026_v55  ;;  %v3278_v33 = vld [vmem:[%s4912_s30 + $0x48] sm:$0xf] }
  0x51   : > { %v4310_v48 = vld [vmem:[%s4927_s26 + $0x7e0] sm:$0xf]  ;;  %v4660_v57 = vld [vmem:[%s4927_s26 + $0x5cc] sm:$0xf0]  ;;  %v3927_v59 = vor.u32 %v4632_v47, %v3926_v46  ;;  %2107 = vmatpush.bf16.msrb.mxu2 %v4183_v45  ;;  %2058 = vmatmul.bf16.vlgmr.msra.gmra.mxu3 %v5030_v58  ;;  %v4471_v37 = vld [vmem:[%s4912_s30 + $0x64] sm:$0xf0] }
  0x52   : > { %v4166_v52 = vld [vmem:[%s4927_s26 + $0x6c0] sm:$0xf]  ;;  %v4311_v60 = vor.u32 %v4728_v51, %v4310_v48  ;;  %v4628_v63 = vld [vmem:[%s4927_s26 + $0x4cc] sm:$0xf0]  ;;  %2088 = vmatpush.bf16.msrb.mxu1 %v4055_v50  ;;  %v4467_v38 = vld [vmem:[%s4912_s30 + $0x4c] sm:$0xf]  ;;  %v5076_v51 = vor.u32 %v4466_v29, %v3272_v30 }
  0x53   : > { %v4038_v56 = vld [vmem:[%s4927_s26 + $0x5c0] sm:$0xf]  ;;  %v4167_v61 = vor.u32 %v4692_v53, %v4166_v52  ;;  %v4724_v2 = vld [vmem:[%s4927_s26 + $0x7cc] sm:$0xf0]  ;;  %2069 = vmatpush.bf16.msrb.mxu0 %v3927_v59  ;;  %v5078_v52 = vor.u32 %v4471_v37, %v3278_v33  ;;  %v4460_v33 = vld [vmem:[%s4912_s30 + $0x14] sm:$0xf] }
  0x54   : > { %v3910_v62 = vld [vmem:[%s4927_s26 + $0x4c0] sm:$0xf]  ;;  %v4039_v1 = vor.u32 %v4660_v57, %v4038_v56  ;;  %v4688_v4 = vld [vmem:[%s4927_s26 + $0x6ac] sm:$0xf0]  ;;  %2126 = vmatpush.bf16.msrb.mxu3 %v4311_v60  ;;  %v5082_v57 = vor.u32 %v4467_v38, %v3280_v39  ;;  %v3416_v37 = vld [vmem:[%s4927_s26 + $0xf0] sm:$0xf0] }
  0x55   : > { %v4294_v0 = vld [vmem:[%s4927_s26 + $0x7c0] sm:$0xf]  ;;  %v4656_v6 = vld [vmem:[%s4927_s26 + $0x5ac] sm:$0xf0]  ;;  %v3911_v7 = vor.u32 %v4628_v63, %v3910_v62  ;;  %2108 = vmatpush.bf16.msrb.mxu2 %v4167_v61  ;;  %v4598_v38 = vld [vmem:[%s4927_s26 + $0x3e4] sm:$0xf] }
  0x56   : > { %v4150_v3 = vld [vmem:[%s4927_s26 + $0x6a0] sm:$0xf]  ;;  %v4295_v8 = vor.u32 %v4724_v2, %v4294_v0  ;;  %v4624_v11 = vld [vmem:[%s4927_s26 + $0x4ac] sm:$0xf0]  ;;  %2089 = vmatpush.bf16.msrb.mxu1 %v4039_v1 }
  0x57   : > { %v4022_v5 = vld [vmem:[%s4927_s26 + $0x5a0] sm:$0xf]  ;;  %v4151_v9 = vor.u32 %v4688_v4, %v4150_v3  ;;  %v4720_v14 = vld [vmem:[%s4927_s26 + $0x7ac] sm:$0xf0]  ;;  %2070 = vmatpush.bf16.msrb.mxu0 %v3911_v7 }
  0x58   : > { %v3894_v10 = vld [vmem:[%s4927_s26 + $0x4a0] sm:$0xf]  ;;  %v4023_v13 = vor.u32 %v4656_v6, %v4022_v5  ;;  %v4684_v16 = vld [vmem:[%s4927_s26 + $0x68c] sm:$0xf0]  ;;  %2127 = vmatpush.bf16.msrb.mxu3 %v4295_v8 }
  0x59   : > { %v4278_v12 = vld [vmem:[%s4927_s26 + $0x7a0] sm:$0xf]  ;;  %v4652_v18 = vld [vmem:[%s4927_s26 + $0x58c] sm:$0xf0]  ;;  %v3895_v19 = vor.u32 %v4624_v11, %v3894_v10  ;;  %2109 = vmatpush.bf16.msrb.mxu2 %v4151_v9 }
  0x5a   : > { %v4134_v15 = vld [vmem:[%s4927_s26 + $0x680] sm:$0xf]  ;;  %v4620_v21 = vld [vmem:[%s4927_s26 + $0x48c] sm:$0xf0]  ;;  %v4279_v23 = vor.u32 %v4720_v14, %v4278_v12  ;;  %2090 = vmatpush.bf16.msrb.mxu1 %v4023_v13 }
  0x5b   : > { %v4006_v17 = vld [vmem:[%s4927_s26 + $0x580] sm:$0xf]  ;;  %v4135_v24 = vor.u32 %v4684_v16, %v4134_v15  ;;  %v4716_v25 = vld [vmem:[%s4927_s26 + $0x78c] sm:$0xf0]  ;;  %2071 = vmatpush.bf16.msrb.mxu0 %v3895_v19  ;;  %v4566_v19 = vld [vmem:[%s4927_s26 + $0x2e4] sm:$0xf] }
  0x5c   : > { %v3878_v20 = vld [vmem:[%s4927_s26 + $0x480] sm:$0xf]  ;;  %v4007_v28 = vor.u32 %v4652_v18, %v4006_v17  ;;  %v4680_v32 = vld [vmem:[%s4927_s26 + $0x66c] sm:$0xf0]  ;;  %2128 = vmatpush.bf16.msrb.mxu3 %v4279_v23  ;;  %v4534_v23 = vld [vmem:[%s4927_s26 + $0x1e4] sm:$0xf] }
  0x5d   : > { %v4262_v22 = vld [vmem:[%s4927_s26 + $0x780] sm:$0xf]  ;;  %v4648_v35 = vld [vmem:[%s4927_s26 + $0x56c] sm:$0xf0]  ;;  %v3879_v36 = vor.u32 %v4620_v21, %v3878_v20  ;;  %2110 = vmatpush.bf16.msrb.mxu2 %v4135_v24  ;;  %v3672_v20 = vld [vmem:[%s4927_s26 + $0x2f0] sm:$0xf0] }
  0x5e   : > { %v3270_v26 = vld [vmem:[%s4912_s30 + $0x40] sm:$0xf]  ;;  %v4263_v40 = vor.u32 %v4716_v25, %v4262_v22  ;;  %v4616_v43 = vld [vmem:[%s4927_s26 + $0x46c] sm:$0xf0]  ;;  %2091 = vmatpush.bf16.msrb.mxu1 %v4007_v28  ;;  %v3544_v24 = vld [vmem:[%s4927_s26 + $0x1f0] sm:$0xf0] }
  0x5f   : > { %v4470_v27 = vld [vmem:[%s4912_s30 + $0x5c] sm:$0xf0]  ;;  %v4712_v47 = vld [vmem:[%s4927_s26 + $0x76c] sm:$0xf0]  ;;  %2072 = vmatpush.bf16.msrb.mxu0 %v3879_v36  ;;  %2025 = vmatmul.bf16.gmra.mxu1 %v5076_v51  ;;  %v4502_v36 = vld [vmem:[%s4927_s26 + $0xe4] sm:$0xf]  ;;  %v3547_v39 = vor.u32 %v4534_v23, %v3544_v24 }
  0x60   : > { %v4118_v31 = vld [vmem:[%s4927_s26 + $0x660] sm:$0xf]  ;;  %v5071_v45 = vor.u32 %v4470_v27, %v3270_v26  ;;  %v4676_v50 = vld [vmem:[%s4927_s26 + $0x64c] sm:$0xf0]  ;;  %2129 = vmatpush.bf16.msrb.mxu3 %v4263_v40  ;;  %2044 = vmatmul.bf16.gmra.mxu2 %v5078_v52  ;;  %v3800_v40 = vld [vmem:[%s4927_s26 + $0x3f0] sm:$0xf0] }
  0x61   : > { %v3990_v34 = vld [vmem:[%s4927_s26 + $0x560] sm:$0xf]  ;;  %v4119_v41 = vor.u32 %v4680_v32, %v4118_v31  ;;  %v4644_v56 = vld [vmem:[%s4927_s26 + $0x54c] sm:$0xf0]  ;;  %2063 = vmatmul.bf16.gmra.mxu3 %v5082_v57  ;;  %v3368_v23 = vld [vmem:[%s4927_s26 + $0x90] sm:$0xf0] }
  0x62   : > { %v3862_v42 = vld [vmem:[%s4927_s26 + $0x460] sm:$0xf]  ;;  %v3991_v46 = vor.u32 %v4648_v35, %v3990_v34  ;;  %v4612_v63 = vld [vmem:[%s4927_s26 + $0x44c] sm:$0xf0]  ;;  %2006 = vmatmul.bf16.gmra.mxu0 %v5071_v45  ;;  %v3256_v34 = vld [vmem:[%s4912_s30 + $0x30] sm:$0xf0]  ;;  %v3675_v35 = vor.u32 %v4566_v19, %v3672_v20 }
  0x63   : > { %v4246_v44 = vld [vmem:[%s4927_s26 + $0x760] sm:$0xf]  ;;  %v3863_v59 = vor.u32 %v4616_v43, %v3862_v42  ;;  %2111 = vmatpush.bf16.msrb.mxu2 %v4119_v41  ;;  %v4708_v2 = vld [vmem:[%s4927_s26 + $0x74c] sm:$0xf0]  ;;  %v4562_v41 = vld [vmem:[%s4927_s26 + $0x2c4] sm:$0xf] }
  0x64   : > { %v4102_v48 = vld [vmem:[%s4927_s26 + $0x640] sm:$0xf]  ;;  %v4247_v60 = vor.u32 %v4712_v47, %v4246_v44  ;;  %2092 = vmatpush.bf16.msrb.mxu1 %v3991_v46  ;;  %v4672_v4 = vld [vmem:[%s4927_s26 + $0x62c] sm:$0xf0]  ;;  %v3656_v42 = vld [vmem:[%s4927_s26 + $0x2d0] sm:$0xf0] }
  0x65   : > { %v3974_v53 = vld [vmem:[%s4927_s26 + $0x540] sm:$0xf]  ;;  %v4103_v61 = vor.u32 %v4676_v50, %v4102_v48  ;;  %v4640_v6 = vld [vmem:[%s4927_s26 + $0x52c] sm:$0xf0]  ;;  %2073 = vmatpush.bf16.msrb.mxu0 %v3863_v59  ;;  %v3262_v44 = vld [vmem:[%s4912_s30 + $0x18] sm:$0xf] }
  0x66   : > { %v3846_v62 = vld [vmem:[%s4927_s26 + $0x440] sm:$0xf]  ;;  %v3975_v1 = vor.u32 %v4644_v56, %v3974_v53  ;;  %2130 = vmatpush.bf16.msrb.mxu3 %v4247_v60  ;;  %v4608_v11 = vld [vmem:[%s4927_s26 + $0x42c] sm:$0xf0]  ;;  %v4465_v46 = vld [vmem:[%s4912_s30 + $0x34] sm:$0xf0]  ;;  %v3419_v53 = vor.u32 %v4502_v36, %v3416_v37  ;;  %v3803_v60 = vor.u32 %v4598_v38, %v3800_v40 }
  0x67   : > { %v4230_v0 = vld [vmem:[%s4927_s26 + $0x740] sm:$0xf]  ;;  %v3847_v7 = vor.u32 %v4612_v63, %v3846_v62  ;;  %2112 = vmatpush.bf16.msrb.mxu2 %v4103_v61  ;;  %v4704_v13 = vld [vmem:[%s4927_s26 + $0x72c] sm:$0xf0]  ;;  %v4461_v47 = vld [vmem:[%s4912_s30 + $0x1c] sm:$0xf]  ;;  %v3659_v61 = vor.u32 %v4562_v41, %v3656_v42 }
  0x68   : > { %v4086_v3 = vld [vmem:[%s4927_s26 + $0x620] sm:$0xf]  ;;  %v4231_v9 = vor.u32 %v4708_v2, %v4230_v0  ;;  %2093 = vmatpush.bf16.msrb.mxu1 %v3975_v1  ;;  %v4668_v16 = vld [vmem:[%s4927_s26 + $0x60c] sm:$0xf0]  ;;  %v3264_v50 = vld [vmem:[%s4912_s30 + $0x38] sm:$0xf0]  ;;  %v5133_v2 = vor.u32 %v4460_v33, %v3256_v34 }
  0x69   : > { %v3958_v5 = vld [vmem:[%s4927_s26 + $0x520] sm:$0xf]  ;;  %v4087_v10 = vor.u32 %v4672_v4, %v4086_v3  ;;  %v4636_v18 = vld [vmem:[%s4927_s26 + $0x50c] sm:$0xf0]  ;;  %2074 = vmatpush.bf16.msrb.mxu0 %v3847_v7  ;;  %v4498_v56 = vld [vmem:[%s4927_s26 + $0xc4] sm:$0xf]  ;;  %v5140_v7 = vor.u32 %v4461_v47, %v3264_v50 }
  0x6a   : > { %v3830_v8 = vld [vmem:[%s4927_s26 + $0x420] sm:$0xf]  ;;  %v3959_v14 = vor.u32 %v4640_v6, %v3958_v5  ;;  %2131 = vmatpush.bf16.msrb.mxu3 %v4231_v9  ;;  %v4604_v27 = vld [vmem:[%s4927_s26 + $0x40c] sm:$0xf0]  ;;  %v3400_v59 = vld [vmem:[%s4927_s26 + $0xd0] sm:$0xf0]  ;;  %v5138_v6 = vor.u32 %v4465_v46, %v3262_v44 }
  0x6b   : > { %v4214_v12 = vld [vmem:[%s4927_s26 + $0x720] sm:$0xf]  ;;  %v3831_v21 = vor.u32 %v4608_v11, %v3830_v8  ;;  %2113 = vmatpush.bf16.msrb.mxu2 %v4087_v10  ;;  %v4700_v29 = vld [vmem:[%s4927_s26 + $0x70c] sm:$0xf0]  ;;  %v4530_v62 = vld [vmem:[%s4927_s26 + $0x1c4] sm:$0xf]  ;;  %v3403_v8 = vor.u32 %v4498_v56, %v3400_v59 }
  0x6c   : > { %v4070_v15 = vld [vmem:[%s4927_s26 + $0x600] sm:$0xf]  ;;  %v4215_v25 = vor.u32 %v4704_v13, %v4214_v12  ;;  %2094 = vmatpush.bf16.msrb.mxu1 %v3959_v14  ;;  %v3254_v31 = vld [vmem:[%s4912_s30 + $0x10] sm:$0xf]  ;;  %v3528_v63 = vld [vmem:[%s4927_s26 + $0x1d0] sm:$0xf0] }
  0x6d   : > { %v3942_v17 = vld [vmem:[%s4927_s26 + $0x500] sm:$0xf]  ;;  %v4071_v26 = vor.u32 %v4668_v16, %v4070_v15  ;;  %v4464_v32 = vld [vmem:[%s4912_s30 + $0x2c] sm:$0xf0]  ;;  %2075 = vmatpush.bf16.msrb.mxu0 %v3831_v21  ;;  %v4594_v0 = vld [vmem:[%s4927_s26 + $0x3c4] sm:$0xf]  ;;  %v3531_v9 = vor.u32 %v4530_v62, %v3528_v63 }
  0x6e   : > { %v3814_v22 = vld [vmem:[%s4927_s26 + $0x400] sm:$0xf]  ;;  %v3943_v30 = vor.u32 %v4636_v18, %v3942_v17  ;;  %2132 = vmatpush.bf16.msrb.mxu3 %v4215_v25  ;;  %v5131_v1 = vor.u32 %v4464_v32, %v3254_v31  ;;  %v3784_v3 = vld [vmem:[%s4927_s26 + $0x3d0] sm:$0xf0]  ;;  %v4558_v4 = vld [vmem:[%s4927_s26 + $0x2a4] sm:$0xf] }
  0x6f   : > { %v4198_v28 = vld [vmem:[%s4927_s26 + $0x700] sm:$0xf]  ;;  %v3815_v43 = vor.u32 %v4604_v27, %v3814_v22  ;;  %2114 = vmatpush.bf16.msrb.mxu2 %v4071_v26  ;;  %v3640_v5 = vld [vmem:[%s4927_s26 + $0x2b0] sm:$0xf0]  ;;  %v4494_v10 = vld [vmem:[%s4927_s26 + $0xa4] sm:$0xf]  ;;  %v3787_v12 = vor.u32 %v4594_v0, %v3784_v3 }
  0x70   : > { %v4199_v48 = vor.u32 %v4700_v29, %v4198_v28  ;;  %2095 = vmatpush.bf16.msrb.mxu1 %v3943_v30  ;;  %v3384_v11 = vld [vmem:[%s4927_s26 + $0xb0] sm:$0xf0]  ;;  %v3643_v13 = vor.u32 %v4558_v4, %v3640_v5  ;;  %v4526_v14 = vld [vmem:[%s4927_s26 + $0x1a4] sm:$0xf]  ;;  %v3286_v37 = vld [vmem:[%s4912_s30 + $0x50] sm:$0xf] }
  0x71   : > { %2076 = vmatpush.bf16.msrb.mxu0 %v3815_v43  ;;  %v3512_v15 = vld [vmem:[%s4927_s26 + $0x1b0] sm:$0xf0]  ;;  %v4590_v16 = vld [vmem:[%s4927_s26 + $0x3a4] sm:$0xf]  ;;  %v3387_v20 = vor.u32 %v4494_v10, %v3384_v11  ;;  %v4472_v38 = vld [vmem:[%s4912_s30 + $0x6c] sm:$0xf0] }
  0x72   : > { %2133 = vmatpush.bf16.msrb.mxu3 %v4199_v48  ;;  %v3768_v17 = vld [vmem:[%s4927_s26 + $0x3b0] sm:$0xf0]  ;;  %v4554_v18 = vld [vmem:[%s4927_s26 + $0x284] sm:$0xf]  ;;  %2115 = vmatmul.bf16.vlgmr.msrb.gmra.mxu2 %v5138_v6  ;;  %v3515_v21 = vor.u32 %v4526_v14, %v3512_v15  ;;  %v3294_v50 = vld [vmem:[%s4912_s30 + $0x58] sm:$0xf] }
  0x73   : > { %2183 = vmatpush.bf16.msra.mxu2 %v3675_v35  ;;  %2096 = vmatmul.bf16.vlgmr.msrb.gmra.mxu1 %v5133_v2  ;;  %v3624_v19 = vld [vmem:[%s4927_s26 + $0x290] sm:$0xf0]  ;;  %v4490_v22 = vld [vmem:[%s4927_s26 + $0x84] sm:$0xf]  ;;  %v3771_v24 = vor.u32 %v4590_v16, %v3768_v17  ;;  %v4469_v56 = vld [vmem:[%s4912_s30 + $0x5c] sm:$0xf] }
  0x74   : > { %2164 = vmatpush.bf16.msra.mxu1 %v3547_v39  ;;  %2077 = vmatmul.bf16.vlgmr.msrb.gmra.mxu0 %v5131_v1  ;;  %v3627_v25 = vor.u32 %v4554_v18, %v3624_v19  ;;  %v4522_v26 = vld [vmem:[%s4927_s26 + $0x184] sm:$0xf]  ;;  %v3496_v27 = vld [vmem:[%s4927_s26 + $0x190] sm:$0xf0]  ;;  %v3371_v32 = vor.u32 %v4490_v22, %v3368_v23  ;;  %v3296_v59 = vld [vmem:[%s4912_s30 + $0x78] sm:$0xf0] }
  0x75   : > { %2145 = vmatpush.bf16.msra.mxu0 %v3419_v53  ;;  %2134 = vmatmul.bf16.vlgmr.msrb.gmra.mxu3 %v5140_v7  ;;  %v4586_v28 = vld [vmem:[%s4927_s26 + $0x384] sm:$0xf]  ;;  %v3752_v29 = vld [vmem:[%s4927_s26 + $0x390] sm:$0xf0]  ;;  %v3499_v33 = vor.u32 %v4522_v26, %v3496_v27  ;;  %v4473_v53 = vld [vmem:[%s4912_s30 + $0x74] sm:$0xf0]  ;;  %v5192_v15 = vor.u32 %v4469_v56, %v3296_v59 }
  0x76   : > { %2202 = vmatpush.bf16.msra.mxu3 %v3803_v60  ;;  %v4550_v30 = vld [vmem:[%s4927_s26 + $0x264] sm:$0xf]  ;;  %v3608_v31 = vld [vmem:[%s4927_s26 + $0x270] sm:$0xf0]  ;;  %v3755_v36 = vor.u32 %v4586_v28, %v3752_v29  ;;  %v5190_v14 = vor.u32 %v4473_v53, %v3294_v50 }
  0x77   : > { %2184 = vmatpush.bf16.msra.mxu2 %v3659_v61  ;;  %v4486_v34 = vld [vmem:[%s4927_s26 + $0x64] sm:$0xf]  ;;  %v3352_v35 = vld [vmem:[%s4927_s26 + $0x70] sm:$0xf0]  ;;  %v3611_v41 = vor.u32 %v4550_v30, %v3608_v31 }
  0x78   : > { %2165 = vmatpush.bf16.msra.mxu1 %v3531_v9  ;;  %v4468_v39 = vld [vmem:[%s4912_s30 + $0x54] sm:$0xf]  ;;  %v4518_v42 = vld [vmem:[%s4927_s26 + $0x164] sm:$0xf]  ;;  %v3355_v60 = vor.u32 %v4486_v34, %v3352_v35  ;;  %v5183_v9 = vor.u32 %v4472_v38, %v3286_v37 }
  0x79   : > { %2146 = vmatpush.bf16.msra.mxu0 %v3403_v8  ;;  %v3288_v40 = vld [vmem:[%s4912_s30 + $0x70] sm:$0xf0]  ;;  %v4582_v44 = vld [vmem:[%s4927_s26 + $0x364] sm:$0xf] }
  0x7a   : > { %2203 = vmatpush.bf16.msra.mxu3 %v3787_v12  ;;  %v3480_v43 = vld [vmem:[%s4927_s26 + $0x170] sm:$0xf0]  ;;  %v4546_v47 = vld [vmem:[%s4927_s26 + $0x244] sm:$0xf]  ;;  %v5185_v10 = vor.u32 %v4468_v39, %v3288_v40 }
  0x7b   : > { %2185 = vmatpush.bf16.msra.mxu2 %v3643_v13  ;;  %v3736_v46 = vld [vmem:[%s4927_s26 + $0x370] sm:$0xf0]  ;;  %v3483_v61 = vor.u32 %v4518_v42, %v3480_v43  ;;  %v4482_v62 = vld [vmem:[%s4927_s26 + $0x44] sm:$0xf] }
  0x7c   : > { %2166 = vmatpush.bf16.msra.mxu1 %v3515_v21  ;;  %v3592_v48 = vld [vmem:[%s4927_s26 + $0x250] sm:$0xf0]  ;;  %v3739_v0 = vor.u32 %v4582_v44, %v3736_v46  ;;  %v4514_v4 = vld [vmem:[%s4927_s26 + $0x144] sm:$0xf] }
  0x7d   : > { %2147 = vmatpush.bf16.msra.mxu0 %v3387_v20  ;;  %v3336_v63 = vld [vmem:[%s4927_s26 + $0x50] sm:$0xf0]  ;;  %v3595_v3 = vor.u32 %v4546_v47, %v3592_v48  ;;  %v4578_v8 = vld [vmem:[%s4927_s26 + $0x344] sm:$0xf] }
  0x7e   : > { %2204 = vmatpush.bf16.msra.mxu3 %v3771_v24  ;;  %v3464_v5 = vld [vmem:[%s4927_s26 + $0x150] sm:$0xf0]  ;;  %v4542_v12 = vld [vmem:[%s4927_s26 + $0x224] sm:$0xf]  ;;  %v3339_v16 = vor.u32 %v4482_v62, %v3336_v63 }
  0x7f   : > { %2186 = vmatpush.bf16.msra.mxu2 %v3627_v25  ;;  %v3720_v11 = vld [vmem:[%s4927_s26 + $0x350] sm:$0xf0]  ;;  %v3467_v17 = vor.u32 %v4514_v4, %v3464_v5  ;;  %v4478_v18 = vld [vmem:[%s4927_s26 + $0x24] sm:$0xf] }
  0x80   : > { %2167 = vmatpush.bf16.msra.mxu1 %v3499_v33  ;;  %v3576_v13 = vld [vmem:[%s4927_s26 + $0x230] sm:$0xf0]  ;;  %v3723_v20 = vor.u32 %v4578_v8, %v3720_v11  ;;  %v4510_v22 = vld [vmem:[%s4927_s26 + $0x124] sm:$0xf] }
  0x81   : > { %2148 = vmatpush.bf16.msra.mxu0 %v3371_v32  ;;  %v3320_v19 = vld [vmem:[%s4927_s26 + $0x30] sm:$0xf0]  ;;  %v3579_v21 = vor.u32 %v4542_v12, %v3576_v13  ;;  %v4574_v24 = vld [vmem:[%s4927_s26 + $0x324] sm:$0xf] }
  0x82   : > { %2205 = vmatpush.bf16.msra.mxu3 %v3755_v36  ;;  %v3448_v23 = vld [vmem:[%s4927_s26 + $0x130] sm:$0xf0]  ;;  %v4538_v26 = vld [vmem:[%s4927_s26 + $0x204] sm:$0xf]  ;;  %2120 = vmatmul.bf16.gmra.mxu2 %v5190_v14  ;;  %v3323_v30 = vor.u32 %v4478_v18, %v3320_v19 }
  0x83   : > { %2187 = vmatpush.bf16.msra.mxu2 %v3611_v41  ;;  %2101 = vmatmul.bf16.gmra.mxu1 %v5185_v10  ;;  %v3704_v25 = vld [vmem:[%s4927_s26 + $0x330] sm:$0xf0]  ;;  %v4694_v28 = vld [vmem:[%s4927_s26 + $0x6e4] sm:$0xf]  ;;  %v3451_v31 = vor.u32 %v4510_v22, %v3448_v23 }
  0x84   : > { %2168 = vmatpush.bf16.msra.mxu1 %v3483_v61  ;;  %2082 = vmatmul.bf16.gmra.mxu0 %v5183_v9  ;;  %v3560_v27 = vld [vmem:[%s4927_s26 + $0x210] sm:$0xf0]  ;;  %v4474_v32 = vld [vmem:[%s4927_s26 + $0x4] sm:$0xf]  ;;  %v3707_v35 = vor.u32 %v4574_v24, %v3704_v25 }
  0x85   : > { %2149 = vmatpush.bf16.msra.mxu0 %v3355_v60  ;;  %2139 = vmatmul.bf16.gmra.mxu3 %v5192_v15  ;;  %v4184_v29 = vld [vmem:[%s4927_s26 + $0x6f0] sm:$0xf0]  ;;  %v4506_v34 = vld [vmem:[%s4927_s26 + $0x104] sm:$0xf]  ;;  %v3563_v36 = vor.u32 %v4538_v26, %v3560_v27 }
  0x86   : > { %2206 = vmatpush.bf16.msra.mxu3 %v3739_v0  ;;  %v3304_v33 = vld [vmem:[%s4927_s26 + $0x10] sm:$0xf0]  ;;  %v4570_v38 = vld [vmem:[%s4927_s26 + $0x304] sm:$0xf]  ;;  %v4187_v40 = vor.u32 %v4694_v28, %v4184_v29 }
  0x87   : > { %2188 = vmatpush.bf16.msra.mxu2 %v3595_v3  ;;  %v3432_v37 = vld [vmem:[%s4927_s26 + $0x110] sm:$0xf0]  ;;  %v4630_v41 = vld [vmem:[%s4927_s26 + $0x4e4] sm:$0xf]  ;;  %v3307_v48 = vor.u32 %v4474_v32, %v3304_v33 }
  0x88   : > { %2169 = vmatpush.bf16.msra.mxu1 %v3467_v17  ;;  %v3688_v39 = vld [vmem:[%s4927_s26 + $0x310] sm:$0xf0]  ;;  %v4662_v43 = vld [vmem:[%s4927_s26 + $0x5e4] sm:$0xf]  ;;  %v3435_v50 = vor.u32 %v4506_v34, %v3432_v37 }
  0x89   : > { %2150 = vmatpush.bf16.msra.mxu0 %v3339_v16  ;;  %v3928_v42 = vld [vmem:[%s4927_s26 + $0x4f0] sm:$0xf0]  ;;  %v4726_v46 = vld [vmem:[%s4927_s26 + $0x7e4] sm:$0xf]  ;;  %v3691_v59 = vor.u32 %v4570_v38, %v3688_v39 }
  0x8a   : > { %2207 = vmatpush.bf16.msra.mxu3 %v3723_v20  ;;  %v4056_v44 = vld [vmem:[%s4927_s26 + $0x5f0] sm:$0xf0]  ;;  %v4690_v53 = vld [vmem:[%s4927_s26 + $0x6c4] sm:$0xf]  ;;  %v3931_v60 = vor.u32 %v4630_v41, %v3928_v42 }
  0x8b   : > { %2189 = vmatpush.bf16.msra.mxu2 %v3579_v21  ;;  %v4312_v47 = vld [vmem:[%s4927_s26 + $0x7f0] sm:$0xf0]  ;;  %v4059_v61 = vor.u32 %v4662_v43, %v4056_v44  ;;  %v4626_v63 = vld [vmem:[%s4927_s26 + $0x4c4] sm:$0xf] }
  0x8c   : > { %2170 = vmatpush.bf16.msra.mxu1 %v3451_v31  ;;  %v4168_v56 = vld [vmem:[%s4927_s26 + $0x6d0] sm:$0xf0]  ;;  %v4315_v62 = vor.u32 %v4726_v46, %v4312_v47  ;;  %v4658_v4 = vld [vmem:[%s4927_s26 + $0x5c4] sm:$0xf] }
  0x8d   : > { %2151 = vmatpush.bf16.msra.mxu0 %v3323_v30  ;;  %v3912_v0 = vld [vmem:[%s4927_s26 + $0x4d0] sm:$0xf0]  ;;  %v4171_v3 = vor.u32 %v4690_v53, %v4168_v56  ;;  %v4722_v11 = vld [vmem:[%s4927_s26 + $0x7c4] sm:$0xf] }
  0x8e   : > { %2208 = vmatpush.bf16.msra.mxu3 %v3707_v35  ;;  %v4040_v5 = vld [vmem:[%s4927_s26 + $0x5d0] sm:$0xf0]  ;;  %v3915_v8 = vor.u32 %v4626_v63, %v3912_v0  ;;  %v4686_v13 = vld [vmem:[%s4927_s26 + $0x6a4] sm:$0xf] }
  0x8f   : > { %2190 = vmatpush.bf16.msra.mxu2 %v3563_v36  ;;  %v4296_v12 = vld [vmem:[%s4927_s26 + $0x7d0] sm:$0xf0]  ;;  %v4622_v17 = vld [vmem:[%s4927_s26 + $0x4a4] sm:$0xf]  ;;  %v4043_v19 = vor.u32 %v4658_v4, %v4040_v5 }
  0x90   : > { %2171 = vmatpush.bf16.msra.mxu1 %v3435_v50  ;;  %v4152_v16 = vld [vmem:[%s4927_s26 + $0x6b0] sm:$0xf0]  ;;  %v4299_v20 = vor.u32 %v4722_v11, %v4296_v12  ;;  %v4654_v21 = vld [vmem:[%s4927_s26 + $0x5a4] sm:$0xf] }
  0x91   : > { %2152 = vmatpush.bf16.msra.mxu0 %v3307_v48  ;;  %v3896_v18 = vld [vmem:[%s4927_s26 + $0x4b0] sm:$0xf0]  ;;  %v4155_v23 = vor.u32 %v4686_v13, %v4152_v16  ;;  %v4718_v25 = vld [vmem:[%s4927_s26 + $0x7a4] sm:$0xf] }
  0x92   : > { %2209 = vmatpush.bf16.msra.mxu3 %v3691_v59  ;;  %v4024_v22 = vld [vmem:[%s4927_s26 + $0x5b0] sm:$0xf0]  ;;  %v3899_v24 = vor.u32 %v4622_v17, %v3896_v18  ;;  %v4682_v27 = vld [vmem:[%s4927_s26 + $0x684] sm:$0xf]  ;;  %2191 = vmatmul.bf16.vlgmr.msra.gmra.mxu2 %v5026_v55 }
  0x93   : > { %2259 = vmatpush.bf16.msrb.mxu2 %v4187_v40  ;;  %v4280_v26 = vld [vmem:[%s4927_s26 + $0x7b0] sm:$0xf0]  ;;  %2172 = vmatmul.bf16.vlgmr.msra.gmra.mxu1 %v5024_v54  ;;  %v4618_v29 = vld [vmem:[%s4927_s26 + $0x484] sm:$0xf]  ;;  %v4027_v31 = vor.u32 %v4654_v21, %v4024_v22 }
  0x94   : > { %2240 = vmatpush.bf16.msrb.mxu1 %v4059_v61  ;;  %2153 = vmatmul.bf16.vlgmr.msra.gmra.mxu0 %v5019_v49  ;;  %v4136_v28 = vld [vmem:[%s4927_s26 + $0x690] sm:$0xf0]  ;;  %v4283_v32 = vor.u32 %v4718_v25, %v4280_v26  ;;  %v4650_v33 = vld [vmem:[%s4927_s26 + $0x584] sm:$0xf] }
  0x95   : > { %2221 = vmatpush.bf16.msrb.mxu0 %v3931_v60  ;;  %v3880_v30 = vld [vmem:[%s4927_s26 + $0x490] sm:$0xf0]  ;;  %2210 = vmatmul.bf16.vlgmr.msra.gmra.mxu3 %v5030_v58  ;;  %v4139_v35 = vor.u32 %v4682_v27, %v4136_v28  ;;  %v4714_v37 = vld [vmem:[%s4927_s26 + $0x784] sm:$0xf] }
  0x96   : > { %2278 = vmatpush.bf16.msrb.mxu3 %v4315_v62  ;;  %v4008_v34 = vld [vmem:[%s4927_s26 + $0x590] sm:$0xf0]  ;;  %v3883_v36 = vor.u32 %v4618_v29, %v3880_v30  ;;  %v4678_v39 = vld [vmem:[%s4927_s26 + $0x664] sm:$0xf] }
  0x97   : > { %2260 = vmatpush.bf16.msrb.mxu2 %v4171_v3  ;;  %v4264_v38 = vld [vmem:[%s4927_s26 + $0x790] sm:$0xf0]  ;;  %v4614_v41 = vld [vmem:[%s4927_s26 + $0x464] sm:$0xf]  ;;  %v4011_v43 = vor.u32 %v4650_v33, %v4008_v34  ;;  %v3422_v33 = vld [vmem:[%s4927_s26 + $0xe8] sm:$0xf] }
  0x98   : > { %2241 = vmatpush.bf16.msrb.mxu1 %v4043_v19  ;;  %v4120_v40 = vld [vmem:[%s4927_s26 + $0x670] sm:$0xf0]  ;;  %v4267_v44 = vor.u32 %v4714_v37, %v4264_v38  ;;  %v4646_v46 = vld [vmem:[%s4927_s26 + $0x564] sm:$0xf]  ;;  %v4505_v34 = vld [vmem:[%s4927_s26 + $0xf4] sm:$0xf0] }
  0x99   : > { %2222 = vmatpush.bf16.msrb.mxu0 %v3915_v8  ;;  %v3864_v42 = vld [vmem:[%s4927_s26 + $0x470] sm:$0xf0]  ;;  %v4123_v48 = vor.u32 %v4678_v39, %v4120_v40  ;;  %v4710_v53 = vld [vmem:[%s4927_s26 + $0x764] sm:$0xf] }
  0x9a   : > { %2279 = vmatpush.bf16.msrb.mxu3 %v4299_v20  ;;  %v3992_v47 = vld [vmem:[%s4927_s26 + $0x570] sm:$0xf0]  ;;  %v3867_v50 = vor.u32 %v4614_v41, %v3864_v42  ;;  %v4674_v59 = vld [vmem:[%s4927_s26 + $0x644] sm:$0xf] }
  0x9b   : > { %2261 = vmatpush.bf16.msrb.mxu2 %v4155_v23  ;;  %v4248_v56 = vld [vmem:[%s4927_s26 + $0x770] sm:$0xf0]  ;;  %v4610_v61 = vld [vmem:[%s4927_s26 + $0x444] sm:$0xf]  ;;  %v3995_v63 = vor.u32 %v4646_v46, %v3992_v47  ;;  %v3423_v47 = vor.u32 %v4505_v34, %v3422_v33  ;;  %v3502_v33 = vld [vmem:[%s4927_s26 + $0x188] sm:$0xf] }
  0x9c   : > { %2242 = vmatpush.bf16.msrb.mxu1 %v4027_v31  ;;  %v4104_v60 = vld [vmem:[%s4927_s26 + $0x650] sm:$0xf0]  ;;  %v4251_v0 = vor.u32 %v4710_v53, %v4248_v56  ;;  %v4642_v3 = vld [vmem:[%s4927_s26 + $0x544] sm:$0xf]  ;;  %v3678_v31 = vld [vmem:[%s4927_s26 + $0x2e8] sm:$0xf] }
  0x9d   : > { %2223 = vmatpush.bf16.msrb.mxu0 %v3899_v24  ;;  %v3848_v62 = vld [vmem:[%s4927_s26 + $0x450] sm:$0xf0]  ;;  %v4107_v5 = vor.u32 %v4674_v59, %v4104_v60  ;;  %v4706_v11 = vld [vmem:[%s4927_s26 + $0x744] sm:$0xf]  ;;  %v3662_v53 = vld [vmem:[%s4927_s26 + $0x2c8] sm:$0xf] }
  0x9e   : > { %2280 = vmatpush.bf16.msrb.mxu3 %v4283_v32  ;;  %v3976_v4 = vld [vmem:[%s4927_s26 + $0x550] sm:$0xf0]  ;;  %v3851_v8 = vor.u32 %v4610_v61, %v3848_v62  ;;  %v4670_v13 = vld [vmem:[%s4927_s26 + $0x624] sm:$0xf]  ;;  %v4569_v32 = vld [vmem:[%s4927_s26 + $0x2f4] sm:$0xf0] }
  0x9f   : > { %2262 = vmatpush.bf16.msrb.mxu2 %v4139_v35  ;;  %v4232_v12 = vld [vmem:[%s4927_s26 + $0x750] sm:$0xf0]  ;;  %v4606_v17 = vld [vmem:[%s4927_s26 + $0x424] sm:$0xf]  ;;  %v3979_v19 = vor.u32 %v4642_v3, %v3976_v4  ;;  %v3679_v46 = vor.u32 %v4569_v32, %v3678_v31  ;;  %v4565_v56 = vld [vmem:[%s4927_s26 + $0x2d4] sm:$0xf0] }
  0xa0   : > { %2243 = vmatpush.bf16.msrb.mxu1 %v4011_v43  ;;  %v4088_v16 = vld [vmem:[%s4927_s26 + $0x630] sm:$0xf0]  ;;  %v4235_v20 = vor.u32 %v4706_v11, %v4232_v12  ;;  %v4638_v21 = vld [vmem:[%s4927_s26 + $0x524] sm:$0xf]  ;;  %v3550_v43 = vld [vmem:[%s4927_s26 + $0x1e8] sm:$0xf]  ;;  %v3663_v4 = vor.u32 %v4565_v56, %v3662_v53 }
  0xa1   : > { %2224 = vmatpush.bf16.msrb.mxu0 %v3883_v36  ;;  %v3832_v18 = vld [vmem:[%s4927_s26 + $0x430] sm:$0xf0]  ;;  %v4702_v23 = vld [vmem:[%s4927_s26 + $0x724] sm:$0xf]  ;;  %v4091_v24 = vor.u32 %v4670_v13, %v4088_v16  ;;  %v3406_v59 = vld [vmem:[%s4927_s26 + $0xc8] sm:$0xf] }
  0xa2   : > { %2281 = vmatpush.bf16.msrb.mxu3 %v4267_v44  ;;  %v3960_v22 = vld [vmem:[%s4927_s26 + $0x530] sm:$0xf0]  ;;  %v3835_v25 = vor.u32 %v4606_v17, %v3832_v18  ;;  %v4666_v27 = vld [vmem:[%s4927_s26 + $0x604] sm:$0xf]  ;;  %2196 = vmatmul.bf16.gmra.mxu2 %v5078_v52  ;;  %v4537_v44 = vld [vmem:[%s4927_s26 + $0x1f4] sm:$0xf0] }
  0xa3   : > { %2263 = vmatpush.bf16.msrb.mxu2 %v4123_v48  ;;  %v4216_v26 = vld [vmem:[%s4927_s26 + $0x730] sm:$0xf0]  ;;  %2177 = vmatmul.bf16.gmra.mxu1 %v5076_v51  ;;  %v4602_v29 = vld [vmem:[%s4927_s26 + $0x404] sm:$0xf]  ;;  %v3963_v35 = vor.u32 %v4638_v21, %v3960_v22  ;;  %v3806_v48 = vld [vmem:[%s4927_s26 + $0x3e8] sm:$0xf] }
  0xa4   : > { %2244 = vmatpush.bf16.msrb.mxu1 %v3995_v63  ;;  %v4072_v28 = vld [vmem:[%s4927_s26 + $0x610] sm:$0xf0]  ;;  %2158 = vmatmul.bf16.gmra.mxu0 %v5071_v45  ;;  %v4219_v36 = vor.u32 %v4702_v23, %v4216_v26  ;;  %v4634_v37 = vld [vmem:[%s4927_s26 + $0x504] sm:$0xf]  ;;  %v4501_v60 = vld [vmem:[%s4927_s26 + $0xd4] sm:$0xf0]  ;;  %v3551_v63 = vor.u32 %v4537_v44, %v3550_v43 }
  0xa5   : > { %2225 = vmatpush.bf16.msrb.mxu0 %v3867_v50  ;;  %v3816_v30 = vld [vmem:[%s4927_s26 + $0x410] sm:$0xf0]  ;;  %2215 = vmatmul.bf16.gmra.mxu3 %v5082_v57  ;;  %v4698_v39 = vld [vmem:[%s4927_s26 + $0x704] sm:$0xf]  ;;  %v4075_v40 = vor.u32 %v4666_v27, %v4072_v28  ;;  %v4601_v50 = vld [vmem:[%s4927_s26 + $0x3f4] sm:$0xf0] }
  0xa6   : > { %2282 = vmatpush.bf16.msrb.mxu3 %v4251_v0  ;;  %v3944_v38 = vld [vmem:[%s4927_s26 + $0x510] sm:$0xf0]  ;;  %v3819_v41 = vor.u32 %v4602_v29, %v3816_v30  ;;  %v3807_v0 = vor.u32 %v4601_v50, %v3806_v48  ;;  %v3534_v3 = vld [vmem:[%s4927_s26 + $0x1c8] sm:$0xf]  ;;  %v4597_v12 = vld [vmem:[%s4927_s26 + $0x3d4] sm:$0xf0] }
  0xa7   : > { %2264 = vmatpush.bf16.msrb.mxu2 %v4107_v5  ;;  %v4200_v42 = vld [vmem:[%s4927_s26 + $0x710] sm:$0xf0]  ;;  %v3947_v61 = vor.u32 %v4634_v37, %v3944_v38  ;;  %v3407_v5 = vor.u32 %v4501_v60, %v3406_v59  ;;  %v3790_v11 = vld [vmem:[%s4927_s26 + $0x3c8] sm:$0xf]  ;;  %v4561_v16 = vld [vmem:[%s4927_s26 + $0x2b4] sm:$0xf0] }
  0xa8   : > { %2245 = vmatpush.bf16.msrb.mxu1 %v3979_v19  ;;  %v4203_v62 = vor.u32 %v4698_v39, %v4200_v42  ;;  %v3646_v13 = vld [vmem:[%s4927_s26 + $0x2a8] sm:$0xf]  ;;  %v3791_v18 = vor.u32 %v4597_v12, %v3790_v11  ;;  %v4529_v22 = vld [vmem:[%s4927_s26 + $0x1b4] sm:$0xf0] }
  0xa9   : > { %2226 = vmatpush.bf16.msrb.mxu0 %v3851_v8  ;;  %v4533_v8 = vld [vmem:[%s4927_s26 + $0x1d4] sm:$0xf0]  ;;  %v3390_v19 = vld [vmem:[%s4927_s26 + $0xa8] sm:$0xf] }
  0xaa   : > { %2283 = vmatpush.bf16.msrb.mxu3 %v4235_v20  ;;  %v3535_v17 = vor.u32 %v4533_v8, %v3534_v3  ;;  %v4497_v20 = vld [vmem:[%s4927_s26 + $0xb4] sm:$0xf0]  ;;  %v3518_v21 = vld [vmem:[%s4927_s26 + $0x1a8] sm:$0xf] }
  0xab   : > { %2265 = vmatpush.bf16.msrb.mxu2 %v4091_v24  ;;  %v3774_v23 = vld [vmem:[%s4927_s26 + $0x3a8] sm:$0xf]  ;;  %v4593_v24 = vld [vmem:[%s4927_s26 + $0x3b4] sm:$0xf0]  ;;  %v3391_v26 = vor.u32 %v4497_v20, %v3390_v19  ;;  %v3519_v29 = vor.u32 %v4529_v22, %v3518_v21 }
  0xac   : > { %2246 = vmatpush.bf16.msrb.mxu1 %v3963_v35  ;;  %v3630_v27 = vld [vmem:[%s4927_s26 + $0x288] sm:$0xf]  ;;  %v4557_v28 = vld [vmem:[%s4927_s26 + $0x294] sm:$0xf0]  ;;  %v3775_v30 = vor.u32 %v4593_v24, %v3774_v23 }
  0xad   : > { %2227 = vmatpush.bf16.msrb.mxu0 %v3835_v25  ;;  %v3647_v25 = vor.u32 %v4561_v16, %v3646_v13  ;;  %v3374_v31 = vld [vmem:[%s4927_s26 + $0x88] sm:$0xf]  ;;  %v4493_v32 = vld [vmem:[%s4927_s26 + $0x94] sm:$0xf0]  ;;  %v3631_v37 = vor.u32 %v4557_v28, %v3630_v27 }
  0xae   : > { %2284 = vmatpush.bf16.msrb.mxu3 %v4219_v36  ;;  %v4525_v34 = vld [vmem:[%s4927_s26 + $0x194] sm:$0xf0]  ;;  %v3758_v35 = vld [vmem:[%s4927_s26 + $0x388] sm:$0xf]  ;;  %v3375_v38 = vor.u32 %v4493_v32, %v3374_v31 }
  0xaf   : > { %2266 = vmatpush.bf16.msrb.mxu2 %v4075_v40  ;;  %v4589_v36 = vld [vmem:[%s4927_s26 + $0x394] sm:$0xf0]  ;;  %v3614_v39 = vld [vmem:[%s4927_s26 + $0x268] sm:$0xf] }
  0xb0   : > { %2247 = vmatpush.bf16.msrb.mxu1 %v3947_v61  ;;  %v4553_v40 = vld [vmem:[%s4927_s26 + $0x274] sm:$0xf0]  ;;  %v3759_v42 = vor.u32 %v4589_v36, %v3758_v35  ;;  %v3358_v43 = vld [vmem:[%s4927_s26 + $0x68] sm:$0xf] }
  0xb1   : > { %2228 = vmatpush.bf16.msrb.mxu0 %v3819_v41  ;;  %v3503_v41 = vor.u32 %v4525_v34, %v3502_v33  ;;  %v4489_v44 = vld [vmem:[%s4927_s26 + $0x74] sm:$0xf0]  ;;  %v3742_v48 = vld [vmem:[%s4927_s26 + $0x368] sm:$0xf]  ;;  %v3615_v53 = vor.u32 %v4553_v40, %v3614_v39 }
  0xb2   : > { %2285 = vmatpush.bf16.msrb.mxu3 %v4203_v62  ;;  %2267 = vmatmul.bf16.vlgmr.msrb.gmra.mxu2 %v5138_v6  ;;  %v4585_v50 = vld [vmem:[%s4927_s26 + $0x374] sm:$0xf0]  ;;  %v3359_v56 = vor.u32 %v4489_v44, %v3358_v43  ;;  %v3598_v59 = vld [vmem:[%s4927_s26 + $0x248] sm:$0xf] }
  0xb3   : > { %2335 = vmatpush.bf16.msra.mxu2 %v3679_v46  ;;  %2248 = vmatmul.bf16.vlgmr.msrb.gmra.mxu1 %v5133_v2  ;;  %v3486_v46 = vld [vmem:[%s4927_s26 + $0x168] sm:$0xf]  ;;  %v4549_v60 = vld [vmem:[%s4927_s26 + $0x254] sm:$0xf0]  ;;  %v3743_v62 = vor.u32 %v4585_v50, %v3742_v48 }
  0xb4   : > { %2316 = vmatpush.bf16.msra.mxu1 %v3551_v63  ;;  %2229 = vmatmul.bf16.vlgmr.msrb.gmra.mxu0 %v5131_v1  ;;  %v3342_v63 = vld [vmem:[%s4927_s26 + $0x48] sm:$0xf]  ;;  %v4581_v8 = vld [vmem:[%s4927_s26 + $0x354] sm:$0xf0]  ;;  %v3599_v11 = vor.u32 %v4549_v60, %v3598_v59 }
  0xb5   : > { %2297 = vmatpush.bf16.msra.mxu0 %v3423_v47  ;;  %2286 = vmatmul.bf16.vlgmr.msrb.gmra.mxu3 %v5140_v7  ;;  %v4521_v47 = vld [vmem:[%s4927_s26 + $0x174] sm:$0xf0]  ;;  %v3470_v3 = vld [vmem:[%s4927_s26 + $0x148] sm:$0xf] }
  0xb6   : > { %2354 = vmatpush.bf16.msra.mxu3 %v3807_v0  ;;  %v3487_v61 = vor.u32 %v4521_v47, %v3486_v46  ;;  %v4485_v0 = vld [vmem:[%s4927_s26 + $0x54] sm:$0xf0]  ;;  %v3582_v13 = vld [vmem:[%s4927_s26 + $0x228] sm:$0xf] }
  0xb7   : > { %2336 = vmatpush.bf16.msra.mxu2 %v3663_v4  ;;  %v4517_v4 = vld [vmem:[%s4927_s26 + $0x154] sm:$0xf0]  ;;  %v3343_v12 = vor.u32 %v4485_v0, %v3342_v63  ;;  %v3326_v19 = vld [vmem:[%s4927_s26 + $0x28] sm:$0xf] }
  0xb8   : > { %2317 = vmatpush.bf16.msra.mxu1 %v3535_v17  ;;  %v4545_v16 = vld [vmem:[%s4927_s26 + $0x234] sm:$0xf0]  ;;  %v3471_v17 = vor.u32 %v4517_v4, %v3470_v3  ;;  %v3454_v21 = vld [vmem:[%s4927_s26 + $0x128] sm:$0xf] }
  0xb9   : > { %2298 = vmatpush.bf16.msra.mxu0 %v3407_v5  ;;  %v3726_v5 = vld [vmem:[%s4927_s26 + $0x348] sm:$0xf]  ;;  %v4481_v20 = vld [vmem:[%s4927_s26 + $0x34] sm:$0xf0] }
  0xba   : > { %2355 = vmatpush.bf16.msra.mxu3 %v3791_v18  ;;  %v3727_v18 = vor.u32 %v4581_v8, %v3726_v5  ;;  %v4513_v22 = vld [vmem:[%s4927_s26 + $0x134] sm:$0xf0]  ;;  %v3710_v23 = vld [vmem:[%s4927_s26 + $0x328] sm:$0xf]  ;;  %v3327_v27 = vor.u32 %v4481_v20, %v3326_v19 }
  0xbb   : > { %2337 = vmatpush.bf16.msra.mxu2 %v3647_v25  ;;  %v4577_v24 = vld [vmem:[%s4927_s26 + $0x334] sm:$0xf0]  ;;  %v3566_v25 = vld [vmem:[%s4927_s26 + $0x208] sm:$0xf]  ;;  %v3455_v31 = vor.u32 %v4513_v22, %v3454_v21 }
  0xbc   : > { %2318 = vmatpush.bf16.msra.mxu1 %v3519_v29  ;;  %v4541_v28 = vld [vmem:[%s4927_s26 + $0x214] sm:$0xf0]  ;;  %v3310_v29 = vld [vmem:[%s4927_s26 + $0x8] sm:$0xf]  ;;  %v3711_v32 = vor.u32 %v4577_v24, %v3710_v23 }
  0xbd   : > { %2299 = vmatpush.bf16.msra.mxu0 %v3391_v26  ;;  %v3583_v26 = vor.u32 %v4545_v16, %v3582_v13  ;;  %v3438_v33 = vld [vmem:[%s4927_s26 + $0x108] sm:$0xf]  ;;  %v4509_v34 = vld [vmem:[%s4927_s26 + $0x114] sm:$0xf0] }
  0xbe   : > { %2356 = vmatpush.bf16.msra.mxu3 %v3775_v30  ;;  %v4477_v30 = vld [vmem:[%s4927_s26 + $0x14] sm:$0xf0]  ;;  %v3694_v35 = vld [vmem:[%s4927_s26 + $0x308] sm:$0xf]  ;;  %v3439_v48 = vor.u32 %v4509_v34, %v3438_v33 }
  0xbf   : > { %2338 = vmatpush.bf16.msra.mxu2 %v3631_v37  ;;  %v4573_v36 = vld [vmem:[%s4927_s26 + $0x314] sm:$0xf0]  ;;  %v4190_v37 = vld [vmem:[%s4927_s26 + $0x6e8] sm:$0xf]  ;;  %v3311_v43 = vor.u32 %v4477_v30, %v3310_v29 }
  0xc0   : > { %2319 = vmatpush.bf16.msra.mxu1 %v3503_v41  ;;  %v3934_v39 = vld [vmem:[%s4927_s26 + $0x4e8] sm:$0xf]  ;;  %v4633_v40 = vld [vmem:[%s4927_s26 + $0x4f4] sm:$0xf0]  ;;  %v3695_v50 = vor.u32 %v4573_v36, %v3694_v35 }
  0xc1   : > { %2300 = vmatpush.bf16.msra.mxu0 %v3375_v38  ;;  %v4697_v38 = vld [vmem:[%s4927_s26 + $0x6f4] sm:$0xf0]  ;;  %v4062_v41 = vld [vmem:[%s4927_s26 + $0x5e8] sm:$0xf] }
  0xc2   : > { %2357 = vmatpush.bf16.msra.mxu3 %v3759_v42  ;;  %2272 = vmatmul.bf16.gmra.mxu2 %v5190_v14  ;;  %v3567_v42 = vor.u32 %v4541_v28, %v3566_v25  ;;  %v4665_v44 = vld [vmem:[%s4927_s26 + $0x5f4] sm:$0xf0]  ;;  %v4318_v46 = vld [vmem:[%s4927_s26 + $0x7e8] sm:$0xf] }
  0xc3   : > { %2339 = vmatpush.bf16.msra.mxu2 %v3615_v53  ;;  %2253 = vmatmul.bf16.gmra.mxu1 %v5185_v10  ;;  %v4729_v47 = vld [vmem:[%s4927_s26 + $0x7f4] sm:$0xf0]  ;;  %v4191_v53 = vor.u32 %v4697_v38, %v4190_v37  ;;  %v4174_v59 = vld [vmem:[%s4927_s26 + $0x6c8] sm:$0xf] }
  0xc4   : > { %2320 = vmatpush.bf16.msra.mxu1 %v3487_v61  ;;  %2234 = vmatmul.bf16.gmra.mxu0 %v5183_v9  ;;  %v4693_v60 = vld [vmem:[%s4927_s26 + $0x6d4] sm:$0xf0]  ;;  %v4063_v61 = vor.u32 %v4665_v44, %v4062_v41  ;;  %v3918_v63 = vld [vmem:[%s4927_s26 + $0x4c8] sm:$0xf] }
  0xc5   : > { %2301 = vmatpush.bf16.msra.mxu0 %v3359_v56  ;;  %2291 = vmatmul.bf16.gmra.mxu3 %v5192_v15  ;;  %v3935_v56 = vor.u32 %v4633_v40, %v3934_v39  ;;  %v4629_v0 = vld [vmem:[%s4927_s26 + $0x4d4] sm:$0xf0]  ;;  %v4046_v3 = vld [vmem:[%s4927_s26 + $0x5c8] sm:$0xf] }
  0xc6   : > { %2358 = vmatpush.bf16.msra.mxu3 %v3743_v62  ;;  %v4319_v62 = vor.u32 %v4729_v47, %v4318_v46  ;;  %v4661_v4 = vld [vmem:[%s4927_s26 + $0x5d4] sm:$0xf0]  ;;  %v4302_v5 = vld [vmem:[%s4927_s26 + $0x7c8] sm:$0xf] }
  0xc7   : > { %2340 = vmatpush.bf16.msra.mxu2 %v3599_v11  ;;  %v4725_v8 = vld [vmem:[%s4927_s26 + $0x7d4] sm:$0xf0]  ;;  %v4175_v11 = vor.u32 %v4693_v60, %v4174_v59  ;;  %v4047_v13 = vor.u32 %v4661_v4, %v4046_v3  ;;  %v3902_v19 = vld [vmem:[%s4927_s26 + $0x4a8] sm:$0xf] }
  0xc8   : > { %2321 = vmatpush.bf16.msra.mxu1 %v3471_v17  ;;  %v4303_v16 = vor.u32 %v4725_v8, %v4302_v5  ;;  %v4158_v17 = vld [vmem:[%s4927_s26 + $0x6a8] sm:$0xf]  ;;  %v4625_v20 = vld [vmem:[%s4927_s26 + $0x4b4] sm:$0xf0] }
  0xc9   : > { %2302 = vmatpush.bf16.msra.mxu0 %v3343_v12  ;;  %v3919_v12 = vor.u32 %v4629_v0, %v3918_v63  ;;  %v4030_v21 = vld [vmem:[%s4927_s26 + $0x5a8] sm:$0xf]  ;;  %v4657_v23 = vld [vmem:[%s4927_s26 + $0x5b4] sm:$0xf0]  ;;  %v3903_v28 = vor.u32 %v4625_v20, %v3902_v19 }
  0xca   : > { %2359 = vmatpush.bf16.msra.mxu3 %v3727_v18  ;;  %v4689_v18 = vld [vmem:[%s4927_s26 + $0x6b4] sm:$0xf0]  ;;  %v4286_v24 = vld [vmem:[%s4927_s26 + $0x7a8] sm:$0xf] }
  0xcb   : > { %2341 = vmatpush.bf16.msra.mxu2 %v3583_v26  ;;  %v4721_v25 = vld [vmem:[%s4927_s26 + $0x7b4] sm:$0xf0]  ;;  %v4142_v29 = vld [vmem:[%s4927_s26 + $0x688] sm:$0xf] }
  0xcc   : > { %2322 = vmatpush.bf16.msra.mxu1 %v3455_v31  ;;  %v5382_v26 = vpop.f32.mrf.mxu1  ;;  %v4685_v30 = vld [vmem:[%s4927_s26 + $0x694] sm:$0xf0]  ;;  %v4031_v31 = vor.u32 %v4657_v23, %v4030_v21  ;;  %v3886_v33 = vld [vmem:[%s4927_s26 + $0x488] sm:$0xf] }
  0xcd   : > { %2303 = vmatpush.bf16.msra.mxu0 %v3327_v27  ;;  %v5377_v22 = vpop.f32.mrf.mxu0  ;;  %v4159_v27 = vor.u32 %v4689_v18, %v4158_v17  ;;  %v4621_v34 = vld [vmem:[%s4927_s26 + $0x494] sm:$0xf0]  ;;  %v4014_v35 = vld [vmem:[%s4927_s26 + $0x588] sm:$0xf]  ;;  %v4143_v39 = vor.u32 %v4685_v30, %v4142_v29 }
  0xce   : > { %2360 = vmatpush.bf16.msra.mxu3 %v3711_v32  ;;  %v4287_v32 = vor.u32 %v4721_v25, %v4286_v24  ;;  %v4653_v36 = vld [vmem:[%s4927_s26 + $0x594] sm:$0xf0]  ;;  %v4270_v37 = vld [vmem:[%s4927_s26 + $0x788] sm:$0xf]  ;;  %v3887_v40 = vor.u32 %v4621_v34, %v3886_v33 }
  0xcf   : > { %2342 = vmatpush.bf16.msra.mxu2 %v3567_v42  ;;  %v4717_v38 = vld [vmem:[%s4927_s26 + $0x794] sm:$0xf0]  ;;  %v4126_v41 = vld [vmem:[%s4927_s26 + $0x668] sm:$0xf]  ;;  %v4015_v44 = vor.u32 %v4653_v36, %v4014_v35 }
  0xd0   : > { %2323 = vmatpush.bf16.msra.mxu1 %v3439_v48  ;;  %v4681_v42 = vld [vmem:[%s4927_s26 + $0x674] sm:$0xf0]  ;;  %v4271_v46 = vor.u32 %v4717_v38, %v4270_v37  ;;  %v3870_v47 = vld [vmem:[%s4927_s26 + $0x468] sm:$0xf] }
  0xd1   : > { %2304 = vmatpush.bf16.msra.mxu0 %v3311_v43  ;;  %v4617_v48 = vld [vmem:[%s4927_s26 + $0x474] sm:$0xf0]  ;;  %v4254_v60 = vld [vmem:[%s4927_s26 + $0x768] sm:$0xf]  ;;  %v4127_v63 = vor.u32 %v4681_v42, %v4126_v41 }
  0xd2   : > { %2361 = vmatpush.bf16.msra.mxu3 %v3695_v50  ;;  %2343 = vmatmul.bf16.vlgmr.msra.gmra.mxu2 %v5026_v55  ;;  %v3998_v50 = vld [vmem:[%s4927_s26 + $0x568] sm:$0xf]  ;;  %v4649_v59 = vld [vmem:[%s4927_s26 + $0x574] sm:$0xf0]  ;;  %v3871_v0 = vor.u32 %v4617_v48, %v3870_v47 }
  0xd3   : > { %2411 = vmatpush.bf16.msrb.mxu2 %v4191_v53  ;;  %2324 = vmatmul.bf16.vlgmr.msra.gmra.mxu1 %v5024_v54  ;;  %v5398_v43 = vpop.f32.mrf.mxu2  ;;  %v4110_v3 = vld [vmem:[%s4927_s26 + $0x648] sm:$0xf]  ;;  %v4677_v4 = vld [vmem:[%s4927_s26 + $0x654] sm:$0xf0]  ;;  %v3999_v5 = vor.u32 %v4649_v59, %v3998_v50 }
  0xd4   : > { %2392 = vmatpush.bf16.msrb.mxu1 %v4063_v61  ;;  %2305 = vmatmul.bf16.vlgmr.msra.gmra.mxu0 %v5019_v49  ;;  %v5403_v53 = vpop.f32.mrf.mxu3  ;;  %v4713_v61 = vld [vmem:[%s4927_s26 + $0x774] sm:$0xf0]  ;;  %v4238_v17 = vld [vmem:[%s4927_s26 + $0x748] sm:$0xf]  ;;  %v4111_v19 = vor.u32 %v4677_v4, %v4110_v3  ;;  %v4535_v3 = vld [vmem:[%s4927_s26 + $0x1ec] sm:$0xf] }
  0xd5   : > { %2373 = vmatpush.bf16.msrb.mxu0 %v3935_v56  ;;  %2362 = vmatmul.bf16.vlgmr.msra.gmra.mxu3 %v5030_v58  ;;  %v5405_v56 = vpop.f32.mrf.mxu0  ;;  %v4255_v8 = vor.u32 %v4713_v61, %v4254_v60  ;;  %v4709_v18 = vld [vmem:[%s4927_s26 + $0x754] sm:$0xf0]  ;;  %v4094_v21 = vld [vmem:[%s4927_s26 + $0x628] sm:$0xf]  ;;  %v4567_v60 = vld [vmem:[%s4927_s26 + $0x2ec] sm:$0xf] }
  0xd6   : > { %2430 = vmatpush.bf16.msrb.mxu3 %v4319_v62  ;;  %v5410_v62 = vpop.f32.mrf.mxu1  ;;  %v4673_v23 = vld [vmem:[%s4927_s26 + $0x634] sm:$0xf0]  ;;  %v3966_v30 = vld [vmem:[%s4927_s26 + $0x528] sm:$0xf]  ;;  %v3680_v61 = vld [vmem:[%s4927_s26 + $0x2f8] sm:$0xf0] }
  0xd7   : > { %2412 = vmatpush.bf16.msrb.mxu2 %v4175_v11  ;;  %v3854_v11 = vld [vmem:[%s4927_s26 + $0x448] sm:$0xf]  ;;  %v4609_v29 = vld [vmem:[%s4927_s26 + $0x434] sm:$0xf0]  ;;  %v4095_v38 = vor.u32 %v4673_v23, %v4094_v21  ;;  %v4563_v23 = vld [vmem:[%s4927_s26 + $0x2cc] sm:$0xf] }
  0xd8   : > { %2393 = vmatpush.bf16.msrb.mxu1 %v4047_v13  ;;  %v3982_v13 = vld [vmem:[%s4927_s26 + $0x548] sm:$0xf]  ;;  %v4641_v33 = vld [vmem:[%s4927_s26 + $0x534] sm:$0xf0] }
  0xd9   : > { %2374 = vmatpush.bf16.msrb.mxu0 %v3919_v12  ;;  %v4613_v12 = vld [vmem:[%s4927_s26 + $0x454] sm:$0xf0]  ;;  %v4222_v34 = vld [vmem:[%s4927_s26 + $0x728] sm:$0xf] }
  0xda   : > { %2431 = vmatpush.bf16.msrb.mxu3 %v4303_v16  ;;  %v4645_v16 = vld [vmem:[%s4927_s26 + $0x554] sm:$0xf0]  ;;  %v3855_v20 = vor.u32 %v4613_v12, %v3854_v11  ;;  %v4078_v37 = vld [vmem:[%s4927_s26 + $0x608] sm:$0xf]  ;;  %v4599_v11 = vld [vmem:[%s4927_s26 + $0x3ec] sm:$0xf] }
  0xdb   : > { %2413 = vmatpush.bf16.msrb.mxu2 %v4159_v27  ;;  %v5422_v24 = vpop.f32.mrf.mxu2  ;;  %v3983_v25 = vor.u32 %v4645_v16, %v3982_v13  ;;  %v4239_v27 = vor.u32 %v4709_v18, %v4238_v17  ;;  %v4705_v35 = vld [vmem:[%s4927_s26 + $0x734] sm:$0xf0]  ;;  %v3822_v41 = vld [vmem:[%s4927_s26 + $0x408] sm:$0xf]  ;;  %v3808_v12 = vld [vmem:[%s4927_s26 + $0x3f8] sm:$0xf0] }
  0xdc   : > { %2394 = vmatpush.bf16.msrb.mxu1 %v4031_v31  ;;  %v5427_v31 = vpop.f32.mrf.mxu3  ;;  %v4605_v42 = vld [vmem:[%s4927_s26 + $0x414] sm:$0xf0]  ;;  %v3950_v47 = vld [vmem:[%s4927_s26 + $0x508] sm:$0xf] }
  0xdd   : > { %2375 = vmatpush.bf16.msrb.mxu0 %v3903_v28  ;;  %v3838_v28 = vld [vmem:[%s4927_s26 + $0x428] sm:$0xf]  ;;  %v4637_v48 = vld [vmem:[%s4927_s26 + $0x514] sm:$0xf0] }
  0xde   : > { %2432 = vmatpush.bf16.msrb.mxu3 %v4287_v32  ;;  %v5434_v36 = vpop.f32.mrf.mxu1  ;;  %v4206_v50 = vld [vmem:[%s4927_s26 + $0x708] sm:$0xf]  ;;  %v4701_v59 = vld [vmem:[%s4927_s26 + $0x714] sm:$0xf0]  ;;  %v3951_v16 = vor.u32 %v4637_v48, %v3950_v47  ;;  %v4559_v47 = vld [vmem:[%s4927_s26 + $0x2ac] sm:$0xf] }
  0xdf   : > { %2414 = vmatpush.bf16.msrb.mxu2 %v4143_v39  ;;  %v5429_v32 = vpop.f32.mrf.mxu0  ;;  %v3839_v39 = vor.u32 %v4609_v29, %v3838_v28  ;;  %v4207_v17 = vor.u32 %v4701_v59, %v4206_v50  ;;  %v3811_v29 = vor.u32 %v4599_v11, %v3808_v12  ;;  %v3648_v48 = vld [vmem:[%s4927_s26 + $0x2b8] sm:$0xf0]  ;;  %v4527_v59 = vld [vmem:[%s4927_s26 + $0x1ac] sm:$0xf] }
  0xe0   : > { %2395 = vmatpush.bf16.msrb.mxu1 %v4015_v44  ;;  %v3967_v44 = vor.u32 %v4641_v33, %v3966_v30  ;;  %v4499_v30 = vld [vmem:[%s4927_s26 + $0xcc] sm:$0xf]  ;;  %v3408_v33 = vld [vmem:[%s4927_s26 + $0xd8] sm:$0xf0] }
  0xe1   : > { %2376 = vmatpush.bf16.msrb.mxu0 %v3887_v40  ;;  %v4669_v40 = vld [vmem:[%s4927_s26 + $0x614] sm:$0xf0]  ;;  %v3392_v50 = vld [vmem:[%s4927_s26 + $0xb8] sm:$0xf0]  ;;  %v4555_v11 = vld [vmem:[%s4927_s26 + $0x28c] sm:$0xf] }
  0xe2   : > { %2433 = vmatpush.bf16.msrb.mxu3 %v4271_v46  ;;  %v4223_v46 = vor.u32 %v4705_v35, %v4222_v34  ;;  %2348 = vmatmul.bf16.gmra.mxu2 %v5078_v52  ;;  %v4079_v4 = vor.u32 %v4669_v40, %v4078_v37  ;;  %v4531_v34 = vld [vmem:[%s4927_s26 + $0x1cc] sm:$0xf]  ;;  %v3536_v35 = vld [vmem:[%s4927_s26 + $0x1d8] sm:$0xf0] }
  0xe3   : > { %2415 = vmatpush.bf16.msrb.mxu2 %v4127_v63  ;;  %2329 = vmatmul.bf16.gmra.mxu1 %v5076_v51  ;;  %v4503_v63 = vld [vmem:[%s4927_s26 + $0xec] sm:$0xf]  ;;  %v5456_v13 = vpop.f32.mrf.mxu2  ;;  %v3632_v12 = vld [vmem:[%s4927_s26 + $0x298] sm:$0xf0] }
  0xe4   : > { %2396 = vmatpush.bf16.msrb.mxu1 %v3999_v5  ;;  %2310 = vmatmul.bf16.gmra.mxu0 %v5071_v45  ;;  %v3823_v5 = vor.u32 %v4605_v42, %v3822_v41  ;;  %v5458_v18 = vpop.f32.mrf.mxu3  ;;  %v4595_v37 = vld [vmem:[%s4927_s26 + $0x3cc] sm:$0xf]  ;;  %v3411_v41 = vor.u32 %v4499_v30, %v3408_v33  ;;  %v3760_v30 = vld [vmem:[%s4927_s26 + $0x398] sm:$0xf0] }
  0xe5   : > { %2377 = vmatpush.bf16.msrb.mxu0 %v3871_v0  ;;  %2367 = vmatmul.bf16.gmra.mxu3 %v5082_v57  ;;  %v3424_v0 = vld [vmem:[%s4927_s26 + $0xf8] sm:$0xf0] }
  0xe6   : > { %2434 = vmatpush.bf16.msrb.mxu3 %v4255_v8  ;;  %v3552_v8 = vld [vmem:[%s4927_s26 + $0x1f8] sm:$0xf0]  ;;  %v3427_v21 = vor.u32 %v4503_v63, %v3424_v0 }
  0xe7   : > { %2416 = vmatpush.bf16.msrb.mxu2 %v4111_v19  ;;  %v5460_v19 = vpop.f32.mrf.mxu0  ;;  %v3555_v28 = vor.u32 %v4535_v3, %v3552_v8  ;;  %v3776_v63 = vld [vmem:[%s4927_s26 + $0x3b8] sm:$0xf0] }
  0xe8   : > { %2397 = vmatpush.bf16.msrb.mxu1 %v3983_v25  ;;  %v3664_v25 = vld [vmem:[%s4927_s26 + $0x2d8] sm:$0xf0] }
  0xe9   : > { %2378 = vmatpush.bf16.msrb.mxu0 %v3855_v20  ;;  %v3683_v20 = vor.u32 %v4567_v60, %v3680_v61  ;;  %v3667_v40 = vor.u32 %v4563_v23, %v3664_v25  ;;  %v3520_v61 = vld [vmem:[%s4927_s26 + $0x1b8] sm:$0xf0]  ;;  %v4491_v23 = vld [vmem:[%s4927_s26 + $0x8c] sm:$0xf] }
  0xea   : > { %2435 = vmatpush.bf16.msrb.mxu3 %v4239_v27  ;;  %v5464_v27 = vpop.f32.mrf.mxu1  ;;  %v4523_v25 = vld [vmem:[%s4927_s26 + $0x18c] sm:$0xf] }
  0xeb   : > { %2417 = vmatpush.bf16.msrb.mxu2 %v4095_v38  ;;  %v3792_v38 = vld [vmem:[%s4927_s26 + $0x3d8] sm:$0xf0] }
  0xec   : > { %2398 = vmatpush.bf16.msrb.mxu1 %v3967_v44  ;;  %v3539_v44 = vor.u32 %v4531_v34, %v3536_v35  ;;  %v5482_v60 = vpop.f32.mrf.mxu3  ;;  %v4551_v34 = vld [vmem:[%s4927_s26 + $0x26c] sm:$0xf]  ;;  %v3616_v35 = vld [vmem:[%s4927_s26 + $0x278] sm:$0xf0] }
  0xed   : > { %2379 = vmatpush.bf16.msrb.mxu0 %v3839_v39  ;;  %v2022_v39 = vadd.f32 %v5382_v26, %v5377_v22  ;;  %v5477_v22 = vpop.f32.mrf.mxu2  ;;  %v4495_v26 = vld [vmem:[%s4927_s26 + $0xac] sm:$0xf] }
  0xee   : > { %2436 = vmatpush.bf16.msrb.mxu3 %v4223_v46  ;;  %v3795_v46 = vor.u32 %v4595_v37, %v3792_v38  ;;  %v3395_v8 = vor.u32 %v4495_v26, %v3392_v50  ;;  %v4487_v37 = vld [vmem:[%s4927_s26 + $0x6c] sm:$0xf]  ;;  %v2027_v50 = vadd.f32 %v5434_v36, %v5429_v32 }
  0xef   : > { %2418 = vmatpush.bf16.msrb.mxu2 %v4079_v4  ;;  %v2041_v42 = vadd.f32 %v5398_v43, %v2022_v39  ;;  %v4591_v43 = vld [vmem:[%s4927_s26 + $0x3ac] sm:$0xf] }
  0xf0   : > { %2399 = vmatpush.bf16.msrb.mxu1 %v3951_v16  ;;  %v2024_v16 = vadd.f32 %v5410_v62, %v5405_v56  ;;  %v3635_v56 = vor.u32 %v4555_v11, %v3632_v12  ;;  %v4483_v11 = vld [vmem:[%s4927_s26 + $0x4c] sm:$0xf]  ;;  %v3344_v12 = vld [vmem:[%s4927_s26 + $0x58] sm:$0xf0] }
  0xf1   : > { %2380 = vmatpush.bf16.msrb.mxu0 %v3823_v5  ;;  %v2060_v0 = vadd.f32 %v5403_v53, %v2041_v42  ;;  %v2078_v3 = vpop.f32.mrf.mxu0  ;;  %v3651_v5 = vor.u32 %v4559_v47, %v3648_v48  ;;  %v3376_v53 = vld [vmem:[%s4927_s26 + $0x98] sm:$0xf0]  ;;  %v4583_v47 = vld [vmem:[%s4927_s26 + $0x36c] sm:$0xf] }
  0xf2   : > { %2437 = vmatpush.bf16.msrb.mxu3 %v4207_v17  ;;  %v2097_v4 = vpop.f32.mrf.mxu1  ;;  %v2043_v33 = vadd.f32 %v5422_v24, %v2024_v16  ;;  %2419 = vmatmul.bf16.vlgmr.msrb.gmra.mxu2 %v5138_v6  ;;  %v3379_v62 = vor.u32 %v4491_v23, %v3376_v53  ;;  %v3488_v42 = vld [vmem:[%s4927_s26 + $0x178] sm:$0xf0]  ;;  %v4515_v16 = vld [vmem:[%s4927_s26 + $0x14c] sm:$0xf]  ;;  %v2046_v23 = vadd.f32 %v5456_v13, %v2027_v50 }
  0xf3   : > { %2487 = vmatpush.bf16.msra.mxu2 %v3683_v20  ;;  %v2079_v17 = vadd.f32 %v2078_v3, %v2060_v0  ;;  %v3523_v20 = vor.u32 %v4527_v59, %v3520_v61  ;;  %2400 = vmatmul.bf16.vlgmr.msrb.gmra.mxu1 %v5133_v2  ;;  %v3744_v48 = vld [vmem:[%s4927_s26 + $0x378] sm:$0xf0]  ;;  %v3619_v0 = vor.u32 %v4551_v34, %v3616_v35  ;;  %v4511_v35 = vld [vmem:[%s4927_s26 + $0x12c] sm:$0xf] }
  0xf4   : > { %2468 = vmatpush.bf16.msra.mxu1 %v3555_v28  ;;  %2381 = vmatmul.bf16.vlgmr.msrb.gmra.mxu0 %v5131_v1  ;;  %v3504_v28 = vld [vmem:[%s4927_s26 + $0x198] sm:$0xf0]  ;;  %v2062_v26 = vadd.f32 %v5427_v31, %v2043_v33  ;;  %v4547_v31 = vld [vmem:[%s4927_s26 + $0x24c] sm:$0xf]  ;;  %v3747_v36 = vor.u32 %v4583_v47, %v3744_v48 }
  0xf5   : > { %2449 = vmatpush.bf16.msra.mxu0 %v3427_v21  ;;  %v3779_v21 = vor.u32 %v4591_v43, %v3776_v63  ;;  %2438 = vmatmul.bf16.vlgmr.msrb.gmra.mxu3 %v5140_v7  ;;  %v2098_v38 = vadd.f32 %v2097_v4, %v2079_v17  ;;  %v3507_v39 = vor.u32 %v4523_v25, %v3504_v28  ;;  %v345_v63 = vld [vmem:[#allocation2 + $0x30] sm:$0xff]  ;;  %v3472_v17 = vld [vmem:[%s4927_s26 + $0x158] sm:$0xf0]  ;;  %v4543_v25 = vld [vmem:[%s4927_s26 + $0x22c] sm:$0xf] }
  0xf6   : > { %2506 = vmatpush.bf16.msra.mxu3 %v3811_v29  ;;  %v4587_v29 = vld [vmem:[%s4927_s26 + $0x38c] sm:$0xf]  ;;  %v3475_v34 = vor.u32 %v4515_v16, %v3472_v17  ;;  %v3936_v16 = vld [vmem:[%s4927_s26 + $0x4f8] sm:$0xf0] }
  0xf7   : > { %2488 = vmatpush.bf16.msra.mxu2 %v3667_v40  ;;  %v3763_v24 = vor.u32 %v4587_v29, %v3760_v30  ;;  %v3360_v40 = vld [vmem:[%s4927_s26 + $0x78] sm:$0xf0]  ;;  %v3347_v29 = vor.u32 %v4483_v11, %v3344_v12  ;;  %v4479_v33 = vld [vmem:[%s4927_s26 + $0x2c] sm:$0xf] }
  0xf8   : > { %2469 = vmatpush.bf16.msra.mxu1 %v3539_v44  ;;  %v2116_v44 = vpop.f32.mrf.mxu2  ;;  %v3363_v3 = vor.u32 %v4487_v37, %v3360_v40  ;;  %v3584_v30 = vld [vmem:[%s4927_s26 + $0x238] sm:$0xf0]  ;;  %v4631_v12 = vld [vmem:[%s4927_s26 + $0x4ec] sm:$0xf] }
  0xf9   : > { %2450 = vmatpush.bf16.msra.mxu0 %v3411_v41  ;;  %v4519_v41 = vld [vmem:[%s4927_s26 + $0x16c] sm:$0xf]  ;;  %v2117_v59 = vadd.f32 %v2116_v44, %v2098_v38  ;;  %v2080_v61 = vpop.f32.mrf.mxu0  ;;  %v3456_v37 = vld [vmem:[%s4927_s26 + $0x138] sm:$0xf0]  ;;  %v3587_v50 = vor.u32 %v4543_v25, %v3584_v30 }
  0xfa   : > { %2507 = vmatpush.bf16.msra.mxu3 %v3795_v46  ;;  %v2135_v46 = vpop.f32.mrf.mxu3  ;;  %v2099_v43 = vpop.f32.mrf.mxu1  ;;  %v3491_v4 = vor.u32 %v4519_v41, %v3488_v42  ;;  %v2081_v32 = vadd.f32 %v2080_v61, %v2062_v26  ;;  %v3712_v40 = vld [vmem:[%s4927_s26 + $0x338] sm:$0xf0]  ;;  %v2065_v41 = vadd.f32 %v5458_v18, %v2046_v23  ;;  %v2029_v42 = vadd.f32 %v5464_v27, %v5460_v19  ;;  %v4539_v26 = vld [vmem:[%s4927_s26 + $0x20c] sm:$0xf] }
  0xfb   : > { %2489 = vmatpush.bf16.msra.mxu2 %v3651_v5  ;;  %v3600_v5 = vld [vmem:[%s4927_s26 + $0x258] sm:$0xf0]  ;;  %v3459_v61 = vor.u32 %v4511_v35, %v3456_v37  ;;  %v4663_v17 = vld [vmem:[%s4927_s26 + $0x5ec] sm:$0xf] }
  0xfc   : > { %2470 = vmatpush.bf16.msra.mxu1 %v3523_v20  ;;  %v4579_v20 = vld [vmem:[%s4927_s26 + $0x34c] sm:$0xf]  ;;  %v3603_v28 = vor.u32 %v4547_v31, %v3600_v5  ;;  %v3568_v18 = vld [vmem:[%s4927_s26 + $0x218] sm:$0xf0] }
  0xfd   : > { %2451 = vmatpush.bf16.msra.mxu0 %v3395_v8  ;;  %v2136_v8 = vadd.f32 %v2135_v46, %v2117_v59  ;;  %v349_v46 = vld [vmem:[#allocation2 + $0x50] sm:$0xff]  ;;  %v4571_v31 = vld [vmem:[%s4927_s26 + $0x30c] sm:$0xf]  ;;  %v3696_v5 = vld [vmem:[%s4927_s26 + $0x318] sm:$0xf0] }
  0xfe   : > { %2508 = vmatpush.bf16.msra.mxu3 %v3779_v21  ;;  %v3728_v21 = vld [vmem:[%s4927_s26 + $0x358] sm:$0xf0] }
  0xff   : > { %2490 = vmatpush.bf16.msra.mxu2 %v3635_v56  ;;  %v2601_v53 = vadd.f32 %v2136_v8, %v345_v63  ;;  %v3328_v56 = vld [vmem:[%s4927_s26 + $0x38] sm:$0xf0]  ;;  %v3731_v13 = vor.u32 %v4579_v20, %v3728_v21  ;;  %v4695_v8 = vld [vmem:[%s4927_s26 + $0x6ec] sm:$0xf]  ;;  %v3571_v20 = vor.u32 %v4539_v26, %v3568_v18 }
 0x100   : > { %2471 = vmatpush.bf16.msra.mxu1 %v3507_v39  ;;  %v2118_v38 = vpop.f32.mrf.mxu2  ;;  %v3331_v59 = vor.u32 %v4479_v33, %v3328_v56  ;;  %v3312_v63 = vld [vmem:[%s4927_s26 + $0x18] sm:$0xf0]  ;;  %v353_v33 = vld [vmem:[#allocation2 + $0x40] sm:$0xff] }
 0x101   : > { %2452 = vmatpush.bf16.msra.mxu0 %v3379_v62  ;;  %2617 = vst [vmem:[#allocation2 + $0x30] sm:$0xff] %v2601_v53  ;;  %v2100_v62 = vadd.f32 %v2099_v43, %v2081_v32  ;;  %v2083_v47 = vpop.f32.mrf.mxu0  ;;  %v4475_v43 = vld [vmem:[%s4927_s26 + $0xc] sm:$0xf]  ;;  %v4192_v32 = vld [vmem:[%s4927_s26 + $0x6f8] sm:$0xf0] }
 0x102   : > { %2509 = vmatpush.bf16.msra.mxu3 %v3763_v24  ;;  %v2137_v39 = vpop.f32.mrf.mxu3  ;;  %v4575_v24 = vld [vmem:[%s4927_s26 + $0x32c] sm:$0xf]  ;;  %v2102_v48 = vpop.f32.mrf.mxu1  ;;  %v2084_v27 = vadd.f32 %v2083_v47, %v2065_v41  ;;  %2424 = vmatmul.bf16.gmra.mxu2 %v5190_v14  ;;  %v3315_v21 = vor.u32 %v4475_v43, %v3312_v63  ;;  %v4064_v23 = vld [vmem:[%s4927_s26 + $0x5f8] sm:$0xf0] }
 0x103   : > { %2491 = vmatpush.bf16.msra.mxu2 %v3619_v0  ;;  %v2119_v44 = vadd.f32 %v2118_v38, %v2100_v62  ;;  %v3715_v0 = vor.u32 %v4575_v24, %v3712_v40  ;;  %2405 = vmatmul.bf16.gmra.mxu1 %v5185_v10  ;;  %v4727_v53 = vld [vmem:[%s4927_s26 + $0x7ec] sm:$0xf]  ;;  %v4320_v25 = vld [vmem:[%s4927_s26 + $0x7f8] sm:$0xf0]  ;;  %v4195_v62 = vor.u32 %v4695_v8, %v4192_v32 }
 0x104   : > { %2472 = vmatpush.bf16.msra.mxu1 %v3491_v4  ;;  %v3440_v4 = vld [vmem:[%s4927_s26 + $0x118] sm:$0xf0]  ;;  %2386 = vmatmul.bf16.gmra.mxu0 %v5183_v9  ;;  %v4067_v40 = vor.u32 %v4663_v17, %v4064_v23  ;;  %v4323_v41 = vor.u32 %v4727_v53, %v4320_v25  ;;  %v4683_v53 = vld [vmem:[%s4927_s26 + $0x68c] sm:$0xf] }
 0x105   : > { %2453 = vmatpush.bf16.msra.mxu0 %v3363_v3  ;;  %v2138_v19 = vadd.f32 %v2137_v39, %v2119_v44  ;;  %v4507_v3 = vld [vmem:[%s4927_s26 + $0x10c] sm:$0xf]  ;;  %2443 = vmatmul.bf16.gmra.mxu3 %v5192_v15  ;;  %v4176_v35 = vld [vmem:[%s4927_s26 + $0x6d8] sm:$0xf0] }
 0x106   : > { %2510 = vmatpush.bf16.msra.mxu3 %v3747_v36  ;;  %v2048_v36 = vadd.f32 %v5477_v22, %v2029_v42  ;;  %v3443_v22 = vor.u32 %v4507_v3, %v3440_v4  ;;  %v4627_v42 = vld [vmem:[%s4927_s26 + $0x4cc] sm:$0xf]  ;;  %v3920_v44 = vld [vmem:[%s4927_s26 + $0x4d8] sm:$0xf0] }
 0x107   : > { %2492 = vmatpush.bf16.msra.mxu2 %v3603_v28  ;;  %v2605_v11 = vadd.f32 %v2138_v19, %v349_v46  ;;  %v2103_v28 = vadd.f32 %v2102_v48, %v2084_v27  ;;  %v4659_v46 = vld [vmem:[%s4927_s26 + $0x5cc] sm:$0xf]  ;;  %v4048_v47 = vld [vmem:[%s4927_s26 + $0x5d8] sm:$0xf0] }
 0x108   : > { %2473 = vmatpush.bf16.msra.mxu1 %v3475_v34  ;;  %v2121_v30 = vpop.f32.mrf.mxu2  ;;  %v3939_v34 = vor.u32 %v4631_v12, %v3936_v16  ;;  %v2067_v37 = vadd.f32 %v5482_v60, %v2048_v36  ;;  %v4723_v48 = vld [vmem:[%s4927_s26 + $0x7cc] sm:$0xf]  ;;  %v4304_v26 = vld [vmem:[%s4927_s26 + $0x7d8] sm:$0xf0]  ;;  %v4051_v43 = vor.u32 %v4659_v46, %v4048_v47 }
 0x109   : > { %2454 = vmatpush.bf16.msra.mxu0 %v3347_v29  ;;  %2621 = vst [vmem:[#allocation2 + $0x50] sm:$0xff] %v2605_v11  ;;  %v3699_v29 = vor.u32 %v4571_v31, %v3696_v5  ;;  %v2122_v38 = vadd.f32 %v2121_v30, %v2103_v28  ;;  %v2085_v39 = vpop.f32.mrf.mxu0  ;;  %v4307_v63 = vor.u32 %v4723_v48, %v4304_v26  ;;  %v4687_v19 = vld [vmem:[%s4927_s26 + $0x6ac] sm:$0xf]  ;;  %v4160_v27 = vld [vmem:[%s4927_s26 + $0x6b8] sm:$0xf0] }
 0x10a   : > { %2511 = vmatpush.bf16.msra.mxu3 %v3731_v13  ;;  %v2140_v56 = vpop.f32.mrf.mxu3  ;;  %v4691_v13 = vld [vmem:[%s4927_s26 + $0x6cc] sm:$0xf]  ;;  %v2104_v24 = vpop.f32.mrf.mxu1  ;;  %v3904_v4 = vld [vmem:[%s4927_s26 + $0x4b8] sm:$0xf0] }
 0x10b   : > { %2493 = vmatpush.bf16.msra.mxu2 %v3587_v50  ;;  %v2141_v50 = vadd.f32 %v2140_v56, %v2122_v38  ;;  %v4179_v60 = vor.u32 %v4691_v13, %v4176_v35  ;;  %v4655_v31 = vld [vmem:[%s4927_s26 + $0x5ac] sm:$0xf]  ;;  %v4032_v32 = vld [vmem:[%s4927_s26 + $0x5b8] sm:$0xf0] }
 0x10c   : > { %2474 = vmatpush.bf16.msra.mxu1 %v3459_v61  ;;  %v3923_v61 = vor.u32 %v4627_v42, %v3920_v44  ;;  %v4719_v36 = vld [vmem:[%s4927_s26 + $0x7ac] sm:$0xf]  ;;  %v4288_v11 = vld [vmem:[%s4927_s26 + $0x7b8] sm:$0xf0] }
 0x10d   : > { %2455 = vmatpush.bf16.msra.mxu0 %v3331_v59  ;;  %v2086_v59 = vadd.f32 %v2085_v39, %v2067_v37  ;;  %v2609_v18 = vadd.f32 %v2141_v50, %v353_v33  ;;  %v4144_v25 = vld [vmem:[%s4927_s26 + $0x698] sm:$0xf0]  ;;  %v4619_v30 = vld [vmem:[%s4927_s26 + $0x48c] sm:$0xf] }
 0x10e   : > { %2512 = vmatpush.bf16.msra.mxu3 %v3715_v0  ;;  %v4623_v0 = vld [vmem:[%s4927_s26 + $0x4ac] sm:$0xf]  ;;  %v3888_v33 = vld [vmem:[%s4927_s26 + $0x498] sm:$0xf0]  ;;  %v4147_v37 = vor.u32 %v4683_v53, %v4144_v25 }
 0x10f   : > { %2494 = vmatpush.bf16.msra.mxu2 %v3571_v20  ;;  %2625 = vst [vmem:[#allocation2 + $0x40] sm:$0xff] %v2609_v18  ;;  %v2105_v3 = vadd.f32 %v2104_v24, %v2086_v59  ;;  %v357_v20 = vld [vmem:[#allocation2 + $0x60] sm:$0xff]  ;;  %v3907_v23 = vor.u32 %v4623_v0, %v3904_v4  ;;  %v4651_v56 = vld [vmem:[%s4927_s26 + $0x58c] sm:$0xf]  ;;  %v4272_v13 = vld [vmem:[%s4927_s26 + $0x798] sm:$0xf0]  ;;  %v3891_v38 = vor.u32 %v4619_v30, %v3888_v33 }
 0x110   : > { %2475 = vmatpush.bf16.msra.mxu1 %v3443_v22  ;;  %v2123_v5 = vpop.f32.mrf.mxu2  ;;  %v4035_v22 = vor.u32 %v4655_v31, %v4032_v32  ;;  %v4128_v39 = vld [vmem:[%s4927_s26 + $0x678] sm:$0xf0]  ;;  %v4711_v46 = vld [vmem:[%s4927_s26 + $0x76c] sm:$0xf] }
 0x111   : > { %2456 = vmatpush.bf16.msra.mxu0 %v3315_v21  ;;  %v2124_v12 = vadd.f32 %v2123_v5, %v2105_v3  ;;  %v5572_v16 = vpop.f32.mrf.mxu0  ;;  %v4163_v21 = vor.u32 %v4687_v19, %v4160_v27  ;;  %v4000_v44 = vld [vmem:[%s4927_s26 + $0x578] sm:$0xf0]  ;;  %v4643_v27 = vld [vmem:[%s4927_s26 + $0x54c] sm:$0xf] }
 0x112   : > { %2513 = vmatpush.bf16.msra.mxu3 %v3699_v29  ;;  %v2142_v8 = vpop.f32.mrf.mxu3  ;;  %v5574_v17 = vpop.f32.mrf.mxu1  ;;  %v4291_v29 = vor.u32 %v4719_v36, %v4288_v11  ;;  %2495 = vmatmul.bf16.vlgmr.msra.gmra.mxu2 %v5026_v55  ;;  %v3872_v55 = vld [vmem:[%s4927_s26 + $0x478] sm:$0xf0]  ;;  %v4707_v3 = vld [vmem:[%s4927_s26 + $0x74c] sm:$0xf] }
 0x113   : > { %2563 = vmatpush.bf16.msrb.mxu2 %v4195_v62  ;;  %v2143_v28 = vadd.f32 %v2142_v8, %v2124_v12  ;;  %2476 = vmatmul.bf16.vlgmr.msra.gmra.mxu1 %v5024_v54  ;;  %v4016_v62 = vld [vmem:[%s4927_s26 + $0x598] sm:$0xf0]  ;;  %v4615_v54 = vld [vmem:[%s4927_s26 + $0x46c] sm:$0xf] }
 0x114   : > { %2544 = vmatpush.bf16.msrb.mxu1 %v4067_v40  ;;  %2457 = vmatmul.bf16.vlgmr.msra.gmra.mxu0 %v5019_v49  ;;  %v4679_v49 = vld [vmem:[%s4927_s26 + $0x66c] sm:$0xf]  ;;  %v4019_v24 = vor.u32 %v4651_v56, %v4016_v62  ;;  %v4256_v47 = vld [vmem:[%s4927_s26 + $0x778] sm:$0xf0]  ;;  %v3875_v59 = vor.u32 %v4615_v54, %v3872_v55 }
 0x115   : > { %2525 = vmatpush.bf16.msrb.mxu0 %v3939_v34  ;;  %v4715_v34 = vld [vmem:[%s4927_s26 + $0x78c] sm:$0xf]  ;;  %v2613_v35 = vadd.f32 %v2143_v28, %v357_v20  ;;  %2514 = vmatmul.bf16.vlgmr.msra.gmra.mxu3 %v5030_v58  ;;  %v4131_v50 = vor.u32 %v4679_v49, %v4128_v39  ;;  %v3856_v19 = vld [vmem:[%s4927_s26 + $0x458] sm:$0xf0] }
 0x116   : > { %2582 = vmatpush.bf16.msrb.mxu3 %v4323_v41  ;;  %v4275_v40 = vor.u32 %v4715_v34, %v4272_v13  ;;  %v4647_v41 = vld [vmem:[%s4927_s26 + $0x56c] sm:$0xf]  ;;  %v3984_v0 = vld [vmem:[%s4927_s26 + $0x558] sm:$0xf0] }
 0x117   : > { %2564 = vmatpush.bf16.msrb.mxu2 %v4179_v60  ;;  %2629 = vst [vmem:[#allocation2 + $0x60] sm:$0xff] %v2613_v35  ;;  %v4675_v60 = vld [vmem:[%s4927_s26 + $0x64c] sm:$0xf]  ;;  %v4003_v18 = vor.u32 %v4647_v41, %v4000_v44  ;;  %v4240_v4 = vld [vmem:[%s4927_s26 + $0x758] sm:$0xf0]  ;;  %v3987_v36 = vor.u32 %v4643_v27, %v3984_v0 }
 0x118   : > { %2545 = vmatpush.bf16.msrb.mxu1 %v4051_v43  ;;  %v5593_v58 = vpop.f32.mrf.mxu2  ;;  %v4259_v43 = vor.u32 %v4711_v46, %v4256_v47  ;;  %v4671_v8 = vld [vmem:[%s4927_s26 + $0x62c] sm:$0xf]  ;;  %v4096_v32 = vld [vmem:[%s4927_s26 + $0x638] sm:$0xf0]  ;;  %v4243_v11 = vor.u32 %v4707_v3, %v4240_v4  ;;  %v346_v4 = vld [vmem:[#allocation2] sm:$0xff] }
 0x119   : > { %2526 = vmatpush.bf16.msrb.mxu0 %v3923_v61  ;;  %v5600_v48 = vpop.f32.mrf.mxu0  ;;  %v4112_v61 = vld [vmem:[%s4927_s26 + $0x658] sm:$0xf0]  ;;  %v4607_v12 = vld [vmem:[%s4927_s26 + $0x42c] sm:$0xf]  ;;  %v4099_v33 = vor.u32 %v4671_v8, %v4096_v32 }
 0x11a   : > { %2583 = vmatpush.bf16.msrb.mxu3 %v4307_v63  ;;  %v5595_v42 = vpop.f32.mrf.mxu3  ;;  %v5602_v26 = vpop.f32.mrf.mxu1  ;;  %v4611_v63 = vld [vmem:[%s4927_s26 + $0x44c] sm:$0xf]  ;;  %v4115_v31 = vor.u32 %v4675_v60, %v4112_v61  ;;  %v3840_v20 = vld [vmem:[%s4927_s26 + $0x438] sm:$0xf0] }
 0x11b   : > { %2565 = vmatpush.bf16.msrb.mxu2 %v4163_v21  ;;  %v3859_v5 = vor.u32 %v4611_v63, %v3856_v19  ;;  %v4639_v21 = vld [vmem:[%s4927_s26 + $0x52c] sm:$0xf]  ;;  %v3968_v25 = vld [vmem:[%s4927_s26 + $0x538] sm:$0xf0]  ;;  %v3843_v56 = vor.u32 %v4607_v12, %v3840_v20 }
 0x11c   : > { %2546 = vmatpush.bf16.msrb.mxu1 %v4035_v22  ;;  %v4703_v28 = vld [vmem:[%s4927_s26 + $0x72c] sm:$0xf]  ;;  %v4224_v22 = vld [vmem:[%s4927_s26 + $0x738] sm:$0xf0]  ;;  %v3971_v13 = vor.u32 %v4639_v21, %v3968_v25 }
 0x11d   : > { %2527 = vmatpush.bf16.msrb.mxu0 %v3907_v23  ;;  %v4667_v62 = vld [vmem:[%s4927_s26 + $0x60c] sm:$0xf]  ;;  %v4080_v34 = vld [vmem:[%s4927_s26 + $0x618] sm:$0xf0]  ;;  %v4227_v35 = vor.u32 %v4703_v28, %v4224_v22 }
 0x11e   : > { %2584 = vmatpush.bf16.msrb.mxu3 %v4291_v29  ;;  %v4635_v49 = vld [vmem:[%s4927_s26 + $0x50c] sm:$0xf]  ;;  %v3952_v39 = vld [vmem:[%s4927_s26 + $0x518] sm:$0xf0] }
 0x11f   : > { %2566 = vmatpush.bf16.msrb.mxu2 %v4147_v37  ;;  %v4603_v37 = vld [vmem:[%s4927_s26 + $0x40c] sm:$0xf]  ;;  %v3955_v41 = vor.u32 %v4635_v49, %v3952_v39 }
 0x120   : > { %2547 = vmatpush.bf16.msrb.mxu1 %v4019_v24  ;;  %v2194_v23 = vpop.f32.mrf.mxu2  ;;  %v4699_v54 = vld [vmem:[%s4927_s26 + $0x70c] sm:$0xf]  ;;  %v4208_v24 = vld [vmem:[%s4927_s26 + $0x718] sm:$0xf0] }
 0x121   : > { %2528 = vmatpush.bf16.msrb.mxu0 %v3891_v38  ;;  %v2159_v29 = vpop.f32.mrf.mxu0  ;;  %v3824_v38 = vld [vmem:[%s4927_s26 + $0x418] sm:$0xf0]  ;;  %v4211_v44 = vor.u32 %v4699_v54, %v4208_v24  ;;  %v350_v12 = vld [vmem:[#allocation2 + $0x68] sm:$0xff] }
 0x122   : > { %2585 = vmatpush.bf16.msrb.mxu3 %v4275_v40  ;;  %v2213_v53 = vpop.f32.mrf.mxu3  ;;  %v2178_v30 = vpop.f32.mrf.mxu1  ;;  %2500 = vmatmul.bf16.gmra.mxu2 %v5078_v52  ;;  %v4083_v40 = vor.u32 %v4667_v62, %v4080_v34  ;;  %v3827_v55 = vor.u32 %v4603_v37, %v3824_v38  ;;  %v354_v34 = vld [vmem:[#allocation2 + $0x20] sm:$0xff] }
 0x123   : > { %2567 = vmatpush.bf16.msrb.mxu2 %v4131_v50  ;;  %2481 = vmatmul.bf16.gmra.mxu1 %v5076_v51  ;;  %v2174_v51 = vadd.f32 %v5574_v17, %v5572_v16 }
 0x124   : > { %2548 = vmatpush.bf16.msrb.mxu1 %v4003_v18  ;;  %2462 = vmatmul.bf16.gmra.mxu0 %v5071_v45 }
 0x125   : > { %2529 = vmatpush.bf16.msrb.mxu0 %v3875_v59  ;;  %2519 = vmatmul.bf16.gmra.mxu3 %v5082_v57  ;;  %v2193_v52 = vadd.f32 %v5593_v58, %v2174_v51 }
 0x126   : > { %2586 = vmatpush.bf16.msrb.mxu3 %v4259_v43  ;;  %v2176_v43 = vadd.f32 %v5602_v26, %v5600_v48 }
 0x127   : > { %2568 = vmatpush.bf16.msrb.mxu2 %v4115_v31  ;;  %v2212_v60 = vadd.f32 %v5595_v42, %v2193_v52  ;;  %v2179_v31 = vadd.f32 %v2178_v30, %v2159_v29 }
 0x128   : > { %2549 = vmatpush.bf16.msrb.mxu1 %v3987_v36  ;;  %v2197_v46 = vpop.f32.mrf.mxu2  ;;  %v2195_v19 = vadd.f32 %v2194_v23, %v2176_v43 }
 0x129   : > { %2530 = vmatpush.bf16.msrb.mxu0 %v3859_v5  ;;  %v2161_v45 = vpop.f32.mrf.mxu0  ;;  %v2198_v5 = vadd.f32 %v2197_v46, %v2179_v31 }
 0x12a   : > { %2587 = vmatpush.bf16.msrb.mxu3 %v4243_v11  ;;  %v2216_v47 = vpop.f32.mrf.mxu3  ;;  %v2180_v50 = vpop.f32.mrf.mxu1  ;;  %v2214_v27 = vadd.f32 %v2213_v53, %v2195_v19 }
 0x12b   : > { %2569 = vmatpush.bf16.msrb.mxu2 %v4099_v33  ;;  %v2181_v20 = vadd.f32 %v2180_v50, %v2161_v45 }
 0x12c   : > { %2550 = vmatpush.bf16.msrb.mxu1 %v3971_v13 }
 0x12d   : > { %2531 = vmatpush.bf16.msrb.mxu0 %v3843_v56 }
 0x12e   : > { %2588 = vmatpush.bf16.msrb.mxu3 %v4227_v35 }
 0x12f   : > { %2570 = vmatpush.bf16.msrb.mxu2 %v4083_v40 }
 0x130   : > { %2551 = vmatpush.bf16.msrb.mxu1 %v3955_v41  ;;  %v2199_v57 = vpop.f32.mrf.mxu2 }
 0x131   : > { %2532 = vmatpush.bf16.msrb.mxu0 %v3827_v55  ;;  %v2230_v61 = vpop.f32.mrf.mxu0  ;;  %v2200_v53 = vadd.f32 %v2199_v57, %v2181_v20 }
 0x132   : > { %2589 = vmatpush.bf16.msrb.mxu3 %v4211_v44  ;;  %v2218_v59 = vpop.f32.mrf.mxu3  ;;  %v2249_v18 = vpop.f32.mrf.mxu1  ;;  %v2231_v63 = vadd.f32 %v2230_v61, %v2212_v60  ;;  %2571 = vmatmul.bf16.vlgmr.msrb.gmra.mxu2 %v5138_v6  ;;  %v2217_v6 = vadd.f32 %v2216_v47, %v2198_v5  ;;  %v347_v5 = vld [vmem:[#allocation2 + $0x58] sm:$0xff] }
 0x133   : > { %2552 = vmatmul.bf16.vlgmr.msrb.gmra.mxu1 %v5133_v2  ;;  %v2219_v30 = vadd.f32 %v2218_v59, %v2200_v53  ;;  %v351_v53 = vld [vmem:[#allocation2 + $0x8] sm:$0xff] }
 0x134   : > { %2533 = vmatmul.bf16.vlgmr.msrb.gmra.mxu0 %v5131_v1  ;;  %v2250_v16 = vadd.f32 %v2249_v18, %v2231_v63 }
 0x135   : > { %2590 = vmatmul.bf16.vlgmr.msrb.gmra.mxu3 %v5140_v7 }
 0x138   : > { %v2268_v17 = vpop.f32.mrf.mxu2 }
 0x139   : > { %v2269_v42 = vadd.f32 %v2268_v17, %v2250_v16  ;;  %v2232_v0 = vpop.f32.mrf.mxu0 }
 0x13a   : > { %v2287_v58 = vpop.f32.mrf.mxu3  ;;  %v2251_v3 = vpop.f32.mrf.mxu1  ;;  %v2233_v26 = vadd.f32 %v2232_v0, %v2214_v27 }
 0x13b   : > { %v2288_v48 = vadd.f32 %v2287_v58, %v2269_v42 }
 0x13c   : > { %v2252_v2 = vadd.f32 %v2251_v3, %v2233_v26 }
 0x13d   : > { %v2602_v1 = vadd.f32 %v2288_v48, %v346_v4 }
 0x13f   : > { %2618 = vst [vmem:[#allocation2] sm:$0xff] %v2602_v1 }
 0x140   : > { %v2270_v8 = vpop.f32.mrf.mxu2 }
 0x141   : > { %v2271_v36 = vadd.f32 %v2270_v8, %v2252_v2  ;;  %v2235_v7 = vpop.f32.mrf.mxu0 }
 0x142   : > { %v2289_v32 = vpop.f32.mrf.mxu3  ;;  %v2254_v11 = vpop.f32.mrf.mxu1  ;;  %v2236_v23 = vadd.f32 %v2235_v7, %v2217_v6  ;;  %2576 = vmatmul.bf16.gmra.mxu2 %v5190_v14 }
 0x143   : > { %v2290_v21 = vadd.f32 %v2289_v32, %v2271_v36  ;;  %2557 = vmatmul.bf16.gmra.mxu1 %v5185_v10 }
 0x144   : > { %2538 = vmatmul.bf16.gmra.mxu0 %v5183_v9  ;;  %v2255_v28 = vadd.f32 %v2254_v11, %v2236_v23 }
 0x145   : > { %v2606_v25 = vadd.f32 %v2290_v21, %v350_v12  ;;  %2595 = vmatmul.bf16.gmra.mxu3 %v5192_v15  ;;  %v358_v15 = vld [vmem:[#allocation2 + $0x70] sm:$0xff] }
 0x147   : > { %2622 = vst [vmem:[#allocation2 + $0x68] sm:$0xff] %v2606_v25 }
 0x148   : > { %v2273_v22 = vpop.f32.mrf.mxu2 }
 0x149   : > { %v2274_v33 = vadd.f32 %v2273_v22, %v2255_v28  ;;  %v2237_v56 = vpop.f32.mrf.mxu0 }
 0x14a   : > { %v2292_v29 = vpop.f32.mrf.mxu3  ;;  %v2256_v62 = vpop.f32.mrf.mxu1  ;;  %v2238_v35 = vadd.f32 %v2237_v56, %v2219_v30 }
 0x14b   : > { %v2293_v13 = vadd.f32 %v2292_v29, %v2274_v33 }
 0x14c   : > { %v2257_v10 = vadd.f32 %v2256_v62, %v2238_v35 }
 0x14d   : > { %v2610_v9 = vadd.f32 %v2293_v13, %v354_v34 }
 0x14f   : > { %2626 = vst [vmem:[#allocation2 + $0x20] sm:$0xff] %v2610_v9 }
 0x150   : > { %v2275_v37 = vpop.f32.mrf.mxu2 }
 0x151   : > { %v2276_v49 = vadd.f32 %v2275_v37, %v2257_v10  ;;  %v2306_v14 = vpop.f32.mrf.mxu0  ;;  %v355_v10 = vld [vmem:[#allocation2 + $0x10] sm:$0xff] }
 0x152   : > { %v2294_v38 = vpop.f32.mrf.mxu3  ;;  %v2325_v39 = vpop.f32.mrf.mxu1 }
 0x153   : > { %v2295_v54 = vadd.f32 %v2294_v38, %v2276_v49  ;;  %v2326_v60 = vadd.f32 %v2325_v39, %v2306_v14 }
 0x155   : > { %v2614_v24 = vadd.f32 %v2295_v54, %v358_v15 }
 0x157   : > { %2630 = vst [vmem:[#allocation2 + $0x70] sm:$0xff] %v2614_v24 }
 0x158   : > { %v2344_v40 = vpop.f32.mrf.mxu2 }
 0x159   : > { %v2308_v41 = vpop.f32.mrf.mxu0  ;;  %v2345_v61 = vadd.f32 %v2344_v40, %v2326_v60 }
 0x15a   : > { %v2363_v55 = vpop.f32.mrf.mxu3  ;;  %v2327_v44 = vpop.f32.mrf.mxu1 }
 0x15b   : > { %v2364_v63 = vadd.f32 %v2363_v55, %v2345_v61  ;;  %v2328_v17 = vadd.f32 %v2327_v44, %v2308_v41  ;;  %v359_v55 = vld [vmem:[#allocation2 + $0x78] sm:$0xff] }
 0x160   : > { %v2346_v46 = vpop.f32.mrf.mxu2 }
 0x161   : > { %v2311_v45 = vpop.f32.mrf.mxu0  ;;  %v2347_v27 = vadd.f32 %v2346_v46, %v2328_v17 }
 0x162   : > { %v2365_v47 = vpop.f32.mrf.mxu3  ;;  %v2330_v50 = vpop.f32.mrf.mxu1 }
 0x163   : > { %v2366_v4 = vadd.f32 %v2365_v47, %v2347_v27  ;;  %v2331_v1 = vadd.f32 %v2330_v50, %v2311_v45 }
 0x168   : > { %v2349_v51 = vpop.f32.mrf.mxu2 }
 0x169   : > { %v2313_v57 = vpop.f32.mrf.mxu0  ;;  %v2350_v32 = vadd.f32 %v2349_v51, %v2331_v1 }
 0x16a   : > { %v2368_v52 = vpop.f32.mrf.mxu3  ;;  %v2332_v59 = vpop.f32.mrf.mxu1 }
 0x16b   : > { %v2369_v12 = vadd.f32 %v2368_v52, %v2350_v32  ;;  %v2333_v25 = vadd.f32 %v2332_v59, %v2313_v57 }
 0x170   : > { %v2351_v18 = vpop.f32.mrf.mxu2 }
 0x171   : > { %v2382_v19 = vpop.f32.mrf.mxu0  ;;  %v2352_v29 = vadd.f32 %v2351_v18, %v2333_v25 }
 0x172   : > { %v2370_v43 = vpop.f32.mrf.mxu3  ;;  %v2401_v16 = vpop.f32.mrf.mxu1  ;;  %v2383_v58 = vadd.f32 %v2382_v19, %v2364_v63 }
 0x173   : > { %v2371_v34 = vadd.f32 %v2370_v43, %v2352_v29 }
 0x174   : > { %v2402_v42 = vadd.f32 %v2401_v16, %v2383_v58 }
 0x178   : > { %v2420_v0 = vpop.f32.mrf.mxu2 }
 0x179   : > { %v2421_v31 = vadd.f32 %v2420_v0, %v2402_v42  ;;  %v2384_v48 = vpop.f32.mrf.mxu0 }
 0x17a   : > { %v2439_v3 = vpop.f32.mrf.mxu3  ;;  %v2403_v26 = vpop.f32.mrf.mxu1  ;;  %v2385_v8 = vadd.f32 %v2384_v48, %v2366_v4 }
 0x17b   : > { %v2440_v2 = vadd.f32 %v2439_v3, %v2421_v31 }
 0x17c   : > { %v2404_v36 = vadd.f32 %v2403_v26, %v2385_v8  ;;  %v348_v8 = vld [vmem:[#allocation2 + $0x18] sm:$0xff] }
 0x17d   : > { %v2603_v6 = vadd.f32 %v2440_v2, %v347_v5 }
 0x17f   : > { %2619 = vst [vmem:[#allocation2 + $0x58] sm:$0xff] %v2603_v6 }
 0x180   : > { %v2422_v7 = vpop.f32.mrf.mxu2 }
 0x181   : > { %v2423_v20 = vadd.f32 %v2422_v7, %v2404_v36  ;;  %v2387_v21 = vpop.f32.mrf.mxu0 }
 0x182   : > { %v2441_v11 = vpop.f32.mrf.mxu3  ;;  %v2406_v23 = vpop.f32.mrf.mxu1  ;;  %v2388_v22 = vadd.f32 %v2387_v21, %v2369_v12 }
 0x183   : > { %v2442_v28 = vadd.f32 %v2441_v11, %v2423_v20 }
 0x184   : > { %v2407_v33 = vadd.f32 %v2406_v23, %v2388_v22  ;;  %v352_v22 = vld [vmem:[#allocation2 + $0x48] sm:$0xff] }
 0x185   : > { %v2607_v30 = vadd.f32 %v2442_v28, %v351_v53 }
 0x187   : > { %2623 = vst [vmem:[#allocation2 + $0x8] sm:$0xff] %v2607_v30 }
 0x188   : > { %v2425_v56 = vpop.f32.mrf.mxu2 }
 0x189   : > { %v2426_v13 = vadd.f32 %v2425_v56, %v2407_v33  ;;  %v2389_v35 = vpop.f32.mrf.mxu0 }
 0x18a   : > { %v2444_v62 = vpop.f32.mrf.mxu3  ;;  %v2408_v9 = vpop.f32.mrf.mxu1  ;;  %v2390_v38 = vadd.f32 %v2389_v35, %v2371_v34 }
 0x18b   : > { %v2445_v37 = vadd.f32 %v2444_v62, %v2426_v13 }
 0x18c   : > { %v2409_v14 = vadd.f32 %v2408_v9, %v2390_v38 }
 0x18d   : > { %v2611_v49 = vadd.f32 %v2445_v37, %v355_v10 }
 0x18f   : > { %2627 = vst [vmem:[#allocation2 + $0x10] sm:$0xff] %v2611_v49  ;;  %v356_v49 = vld [vmem:[#allocation2 + $0x38] sm:$0xff] }
 0x190   : > { %v2427_v39 = vpop.f32.mrf.mxu2 }
 0x191   : > { %v2428_v54 = vadd.f32 %v2427_v39, %v2409_v14  ;;  %v2458_v24 = vpop.f32.mrf.mxu0 }
 0x192   : > { %v2446_v15 = vpop.f32.mrf.mxu3  ;;  %v2477_v40 = vpop.f32.mrf.mxu1 }
 0x193   : > { %v2447_v41 = vadd.f32 %v2446_v15, %v2428_v54  ;;  %v2478_v63 = vadd.f32 %v2477_v40, %v2458_v24 }
 0x195   : > { %v2615_v44 = vadd.f32 %v2447_v41, %v359_v55  ;;  %v360_v41 = vld [vmem:[#allocation2 + $0x28] sm:$0xff] }
 0x197   : > { %2631 = vst [vmem:[#allocation2 + $0x78] sm:$0xff] %v2615_v44 }
 0x198   : > { %v2496_v46 = vpop.f32.mrf.mxu2 }
 0x199   : > { %v2460_v45 = vpop.f32.mrf.mxu0  ;;  %v2497_v19 = vadd.f32 %v2496_v46, %v2478_v63 }
 0x19a   : > { %v2515_v47 = vpop.f32.mrf.mxu3  ;;  %v2479_v50 = vpop.f32.mrf.mxu1 }
 0x19b   : > { %v2516_v58 = vadd.f32 %v2515_v47, %v2497_v19  ;;  %v2480_v0 = vadd.f32 %v2479_v50, %v2460_v45 }
 0x1a0   : > { %v2498_v51 = vpop.f32.mrf.mxu2 }
 0x1a1   : > { %v2463_v57 = vpop.f32.mrf.mxu0  ;;  %v2499_v4 = vadd.f32 %v2498_v51, %v2480_v0 }
 0x1a2   : > { %v2517_v52 = vpop.f32.mrf.mxu3  ;;  %v2482_v59 = vpop.f32.mrf.mxu1 }
 0x1a3   : > { %v2518_v5 = vadd.f32 %v2517_v52, %v2499_v4  ;;  %v2483_v6 = vadd.f32 %v2482_v59, %v2463_v57 }
 0x1a8   : > { %v2501_v60 = vpop.f32.mrf.mxu2 }
 0x1a9   : > { %v2465_v18 = vpop.f32.mrf.mxu0  ;;  %v2502_v11 = vadd.f32 %v2501_v60, %v2483_v6 }
 0x1aa   : > { %v2520_v61 = vpop.f32.mrf.mxu3  ;;  %v2484_v43 = vpop.f32.mrf.mxu1 }
 0x1ab   : > { %v2521_v53 = vadd.f32 %v2520_v61, %v2502_v11  ;;  %v2485_v29 = vadd.f32 %v2484_v43, %v2465_v18 }
 0x1b0   : > { %v2503_v16 = vpop.f32.mrf.mxu2 }
 0x1b1   : > { %v2534_v27 = vpop.f32.mrf.mxu0  ;;  %v2504_v62 = vadd.f32 %v2503_v16, %v2485_v29 }
 0x1b2   : > { %v2522_v17 = vpop.f32.mrf.mxu3  ;;  %v2553_v42 = vpop.f32.mrf.mxu1  ;;  %v2535_v3 = vadd.f32 %v2534_v27, %v2516_v58 }
 0x1b3   : > { %v2523_v10 = vadd.f32 %v2522_v17, %v2504_v62 }
 0x1b4   : > { %v2554_v31 = vadd.f32 %v2553_v42, %v2535_v3 }
 0x1b8   : > { %v2572_v48 = vpop.f32.mrf.mxu2 }
 0x1b9   : > { %v2573_v1 = vadd.f32 %v2572_v48, %v2554_v31  ;;  %v2536_v2 = vpop.f32.mrf.mxu0 }
 0x1ba   : > { %v2591_v26 = vpop.f32.mrf.mxu3  ;;  %v2555_v32 = vpop.f32.mrf.mxu1  ;;  %v2537_v7 = vadd.f32 %v2536_v2, %v2518_v5 }
 0x1bb   : > { %v2592_v36 = vadd.f32 %v2591_v26, %v2573_v1 }
 0x1bc   : > { %v2556_v20 = vadd.f32 %v2555_v32, %v2537_v7 }
 0x1bd   : > { %v2604_v12 = vadd.f32 %v2592_v36, %v348_v8 }
 0x1bf   : > { %2620 = vst [vmem:[#allocation2 + $0x18] sm:$0xff] %v2604_v12 }
 0x1c0   : > { %v2574_v21 = vpop.f32.mrf.mxu2 }
 0x1c1   : > { %v2575_v25 = vadd.f32 %v2574_v21, %v2556_v20  ;;  %v2539_v28 = vpop.f32.mrf.mxu0 }
 0x1c2   : > { %v2593_v23 = vpop.f32.mrf.mxu3  ;;  %v2540_v33 = vadd.f32 %v2539_v28, %v2521_v53  ;;  %v2558_v56 = vpop.f32.mrf.mxu1 }
 0x1c3   : > { %v2594_v30 = vadd.f32 %v2593_v23, %v2575_v25 }
 0x1c4   : > { %v2559_v13 = vadd.f32 %v2558_v56, %v2540_v33 }
 0x1c5   : > { %v2608_v34 = vadd.f32 %v2594_v30, %v352_v22 }
 0x1c7   : > { %2624 = vst [vmem:[#allocation2 + $0x48] sm:$0xff] %v2608_v34 }
 0x1c8   : > { %v2577_v35 = vpop.f32.mrf.mxu2 }
 0x1c9   : > { %v2578_v37 = vadd.f32 %v2577_v35, %v2559_v13  ;;  %v2541_v38 = vpop.f32.mrf.mxu0 }
 0x1ca   : > { %v2596_v9 = vpop.f32.mrf.mxu3  ;;  %v2542_v39 = vadd.f32 %v2541_v38, %v2523_v10  ;;  %v2560_v54 = vpop.f32.mrf.mxu1 }
 0x1cb   : > { %v2597_v14 = vadd.f32 %v2596_v9, %v2578_v37 }
 0x1cc   : > { %v2561_v24 = vadd.f32 %v2560_v54, %v2542_v39 }
 0x1cd   : > { %v2612_v15 = vadd.f32 %v2597_v14, %v356_v49 }
 0x1cf   : > { %2628 = vst [vmem:[#allocation2 + $0x38] sm:$0xff] %v2612_v15 }
 0x1d0   : > { %v2579_v40 = vpop.f32.mrf.mxu2 }
 0x1d1   : > { %v2580_v55 = vadd.f32 %v2579_v40, %v2561_v24 }
 0x1d2   : > { %v2598_v44 = vpop.f32.mrf.mxu3 }
 0x1d3   : > { %v2599_v46 = vadd.f32 %v2598_v44, %v2580_v55  ;;  %2636 = sbr.rel (%p4324_p8) target bundleno = 667 (0x29b), region = 48 }
 0x1d5   : > { %v2616_v47 = vadd.f32 %v2599_v46, %v360_v41 }
 0x1d7   : > { %2632 = vst [vmem:[#allocation2 + $0x28] sm:$0xff] %v2616_v47 }
 0x1d8   : > { %v4737_v45 = vld [vmem:[%s4932_s27 + $0x38] sm:$0xff]  ;;  %v4736_v57 = vld [vmem:[%s4932_s27 + $0x30] sm:$0xff]  ;;  %v4735_v18 = vld [vmem:[%s4932_s27 + $0x28] sm:$0xff] }
 0x1d9   : > { %v4745_v50 = vld [vmem:[%s4932_s27 + $0x78] sm:$0xff]  ;;  %3017 = vmatpush.bf16.msra.mxu0 %v4737_v45  ;;  %v4744_v59 = vld [vmem:[%s4932_s27 + $0x70] sm:$0xff]  ;;  %v4743_v43 = vld [vmem:[%s4932_s27 + $0x68] sm:$0xff] }
 0x1da   : > { %v4753_v51 = vld [vmem:[%s4932_s27 + $0xb8] sm:$0xff]  ;;  %3036 = vmatpush.bf16.msra.mxu1 %v4745_v50  ;;  %v4752_v60 = vld [vmem:[%s4932_s27 + $0xb0] sm:$0xff]  ;;  %v4751_v63 = vld [vmem:[%s4932_s27 + $0xa8] sm:$0xff] }
 0x1db   : > { %v4761_v52 = vld [vmem:[%s4932_s27 + $0xf8] sm:$0xff]  ;;  %3055 = vmatpush.bf16.msra.mxu2 %v4753_v51  ;;  %v4760_v61 = vld [vmem:[%s4932_s27 + $0xf0] sm:$0xff]  ;;  %v4759_v19 = vld [vmem:[%s4932_s27 + $0xe8] sm:$0xff] }
 0x1dc   : > { %3074 = vmatpush.bf16.msra.mxu3 %v4761_v52  ;;  %v4734_v16 = vld [vmem:[%s4932_s27 + $0x20] sm:$0xff]  ;;  %v2637_v42 = vld [vmem:[#allocation2 + $0x30] sm:$0xff]  ;;  %v2642_v5 = vld [vmem:[#allocation2 + $0x68] sm:$0xff] }
 0x1dd   : > { %3018 = vmatpush.bf16.msra.mxu0 %v4736_v57  ;;  %v4742_v17 = vld [vmem:[%s4932_s27 + $0x60] sm:$0xff]  ;;  %v2641_v0 = vld [vmem:[#allocation2 + $0x50] sm:$0xff]  ;;  %v2639_v8 = vld [vmem:[#allocation2 + $0x58] sm:$0xff] }
 0x1de   : > { %3037 = vmatpush.bf16.msra.mxu1 %v4744_v59  ;;  %v4750_v58 = vld [vmem:[%s4932_s27 + $0xa0] sm:$0xff]  ;;  %v2643_v32 = vld [vmem:[#allocation2 + $0x8] sm:$0xff]  ;;  %v4733_v7 = vld [vmem:[%s4932_s27 + $0x18] sm:$0xff] }
 0x1df   : > { %3056 = vmatpush.bf16.msra.mxu2 %v4752_v60  ;;  %v4758_v27 = vld [vmem:[%s4932_s27 + $0xe0] sm:$0xff]  ;;  %v4741_v11 = vld [vmem:[%s4932_s27 + $0x58] sm:$0xff]  ;;  %v2644_v33 = vld [vmem:[#allocation2 + $0x48] sm:$0xff] }
 0x1e0   : > { %3075 = vmatpush.bf16.msra.mxu3 %v4760_v61  ;;  %v2653_v3 = vld [vmem:[%s4917_s12] sm:$0xf]  ;;  %v2640_v53 = vld [vmem:[#allocation2 + $0x18] sm:$0xff]  ;;  %v4732_v35 = vld [vmem:[%s4932_s27 + $0x10] sm:$0xff] }
 0x1e1   : > { %3019 = vmatpush.bf16.msra.mxu0 %v4735_v18  ;;  %v2679_v4 = vld [vmem:[%s4922_s16] sm:$0xf]  ;;  %v5665_v31 = vperm.slane %v2653_v3, 0  ;;  %v5669_v1 = vperm.slane %v2653_v3, 1  ;;  %v5673_v6 = vperm.slane %v2653_v3, 2  ;;  %v5675_v36 = vperm.slane %v2653_v3, 3 }
 0x1e2   : > { %3038 = vmatpush.bf16.msra.mxu1 %v4743_v43  ;;  %v5667_v48 = vperm.slane %v2679_v4, 0  ;;  %v2638_v26 = vld [vmem:[#allocation2] sm:$0xff]  ;;  %v5671_v2 = vperm.slane %v2679_v4, 1  ;;  %v5682_v23 = vperm.slane %v2679_v4, 2  ;;  %v4749_v25 = vld [vmem:[%s4932_s27 + $0x98] sm:$0xff]  ;;  %v4740_v9 = vld [vmem:[%s4932_s27 + $0x50] sm:$0xff] }
 0x1e3   : > { %3057 = vmatpush.bf16.msra.mxu2 %v4751_v63  ;;  %v2663_v12 = vmul.f32 %v5665_v31, %v2637_v42  ;;  %v2667_v20 = vmul.f32 %v5665_v31, %v2641_v0  ;;  %v2664_v21 = vmul.f32 %v5669_v1, %v2638_v26  ;;  %v4757_v28 = vld [vmem:[%s4932_s27 + $0xd8] sm:$0xff]  ;;  %v2668_v22 = vmul.f32 %v5669_v1, %v2642_v5  ;;  %v4748_v14 = vld [vmem:[%s4932_s27 + $0x90] sm:$0xff]  ;;  %v4731_v54 = vld [vmem:[%s4932_s27 + $0x8] sm:$0xff] }
 0x1e4   : > { %3076 = vmatpush.bf16.msra.mxu3 %v4759_v19  ;;  %v2665_v29 = vmul.f32 %v5673_v6, %v2639_v8  ;;  %v2669_v30 = vmul.f32 %v5673_v6, %v2643_v32  ;;  %v2666_v13 = vmul.f32 %v5675_v36, %v2640_v53  ;;  %v2670_v38 = vmul.f32 %v5675_v36, %v2644_v33  ;;  %v4756_v39 = vld [vmem:[%s4932_s27 + $0xd0] sm:$0xff]  ;;  %v4739_v41 = vld [vmem:[%s4932_s27 + $0x48] sm:$0xff]  ;;  %v4730_v59 = vld [vmem:[%s4932_s27] sm:$0xff] }
 0x1e5   : > { %3020 = vmatpush.bf16.msra.mxu0 %v4734_v16  ;;  %v2689_v56 = vadd.f32 %v5667_v48, %v2663_v12  ;;  %v2693_v62 = vadd.f32 %v5667_v48, %v2667_v20  ;;  %v2690_v34 = vadd.f32 %v5671_v2, %v2664_v21  ;;  %v2694_v10 = vadd.f32 %v5671_v2, %v2668_v22  ;;  %v4747_v44 = vld [vmem:[%s4932_s27 + $0x88] sm:$0xff]  ;;  %v2645_v43 = vld [vmem:[#allocation2 + $0x40] sm:$0xff]  ;;  %v2650_v42 = vld [vmem:[#allocation2 + $0x70] sm:$0xff] }
 0x1e6   : > { %3039 = vmatpush.bf16.msra.mxu1 %v4742_v17  ;;  %v2691_v37 = vadd.f32 %v5682_v23, %v2665_v29  ;;  %v5698_v49 = vperm.slane %v2679_v4, 3  ;;  %v2695_v15 = vadd.f32 %v5682_v23, %v2669_v30  ;;  %v4755_v51 = vld [vmem:[%s4932_s27 + $0xc8] sm:$0xff]  ;;  %v2649_v63 = vld [vmem:[#allocation2 + $0x60] sm:$0xff]  ;;  %v2647_v8 = vld [vmem:[#allocation2 + $0x10] sm:$0xff]  ;;  %v2671_v32 = vmul.f32 %v5665_v31, %v2645_v43 }
 0x1e7   : > { %3058 = vmatpush.bf16.msra.mxu2 %v4750_v58  ;;  %vm2705_vm0 = vcmp.ge.f32.partialorder %v2689_v56, 0.0  ;;  %vm2709_vm1 = vcmp.ge.f32.partialorder %v2693_v62, 0.0  ;;  %v2721_v24 = vmul.f32 0.1, %v2689_v56  ;;  %v2725_v40 = vmul.f32 0.1, %v2693_v62 }
 0x1e8   : > { %3077 = vmatpush.bf16.msra.mxu3 %v4758_v27  ;;  %v2722_v55 = vmul.f32 0.1, %v2690_v34  ;;  %v2726_v46 = vmul.f32 0.1, %v2694_v10  ;;  %v2723_v47 = vmul.f32 0.1, %v2691_v37  ;;  %v2692_v45 = vadd.f32 %v5698_v49, %v2666_v13 }
 0x1e9   : > { %3021 = vmatpush.bf16.msra.mxu0 %v4733_v7  ;;  %v2696_v50 = vadd.f32 %v5698_v49, %v2670_v38  ;;  %vm2706_vm2 = vcmp.ge.f32.partialorder %v2690_v34, 0.0  ;;  %vm2710_vm3 = vcmp.ge.f32.partialorder %v2694_v10, 0.0  ;;  %vm2707_vm4 = vcmp.ge.f32.partialorder %v2691_v37, 0.0  ;;  %v4738_v19 = vld [vmem:[%s4932_s27 + $0x40] sm:$0xff]  ;;  %v2648_v12 = vld [vmem:[#allocation2 + $0x38] sm:$0xff] }
 0x1ea   : > { %3040 = vmatpush.bf16.msra.mxu1 %v4741_v11  ;;  %v2727_v52 = vmul.f32 0.1, %v2695_v15  ;;  %vm2711_vm5 = vcmp.ge.f32.partialorder %v2695_v15, 0.0  ;;  %vm2708_vm6 = vcmp.ge.f32.partialorder %v2692_v45, 0.0  ;;  %v2724_v57 = vmul.f32 0.1, %v2692_v45 }
 0x1eb   : > { %3059 = vmatpush.bf16.msra.mxu2 %v4749_v25  ;;  %vm2712_vm7 = vcmp.ge.f32.partialorder %v2696_v50, 0.0  ;;  %v2737_v60 = vsel %vm2705_vm0, %v2689_v56, %v2721_v24  ;;  %v2741_v61 = vsel %vm2709_vm1, %v2693_v62, %v2725_v40  ;;  %v2728_v18 = vmul.f32 0.1, %v2696_v50  ;;  %v2646_v27 = vld [vmem:[#allocation2 + $0x20] sm:$0xff]  ;;  %v2651_v11 = vld [vmem:[#allocation2 + $0x78] sm:$0xff] }
 0x1ec   : > { %3078 = vmatpush.bf16.msra.mxu3 %v4757_v28  ;;  %v2738_v16 = vsel %vm2706_vm2, %v2690_v34, %v2722_v55  ;;  %v2742_v17 = vsel %vm2710_vm3, %v2694_v10, %v2726_v46  ;;  %v2739_v58 = vsel %vm2707_vm4, %v2691_v37, %v2723_v47  ;;  %v4746_v0 = vld [vmem:[%s4932_s27 + $0x80] sm:$0xff]  ;;  %v2743_v4 = vsel %vm2711_vm5, %v2695_v15, %v2727_v52  ;;  %v2652_v28 = vld [vmem:[#allocation2 + $0x28] sm:$0xff] }
 0x1ed   : > { %3022 = vmatpush.bf16.msra.mxu0 %v4732_v35  ;;  %v4754_v3 = vld [vmem:[%s4932_s27 + $0xc0] sm:$0xff]  ;;  %v2740_v26 = vsel %vm2708_vm6, %v2692_v45, %v2724_v57  ;;  %v2744_v5 = vsel %vm2712_vm7, %v2696_v50, %v2728_v18  ;;  %v2675_v7 = vmul.f32 %v5665_v31, %v2649_v63  ;;  %v2753_v20 = vpack.c.bf16 %v2741_v61, %v2737_v60 }
 0x1ee   : > { %3041 = vmatpush.bf16.msra.mxu1 %v4740_v9  ;;  %v2754_v21 = vpack.c.bf16 %v2742_v17, %v2738_v16  ;;  %v2672_v53 = vmul.f32 %v5669_v1, %v2646_v27  ;;  %v2676_v25 = vmul.f32 %v5669_v1, %v2650_v42  ;;  %v2755_v22 = vpack.c.bf16 %v2743_v4, %v2739_v58 }
 0x1ef   : > { %3060 = vmatpush.bf16.msra.mxu2 %v4748_v14  ;;  %v2756_v29 = vpack.c.bf16 %v2744_v5, %v2740_v26  ;;  %v2673_v30 = vmul.f32 %v5673_v6, %v2647_v8  ;;  %v2677_v33 = vmul.f32 %v5673_v6, %v2651_v11  ;;  %v2674_v31 = vmul.f32 %v5675_v36, %v2648_v12 }
 0x1f0   : > { %3079 = vmatpush.bf16.msra.mxu3 %v4756_v39  ;;  %v2697_v56 = vadd.f32 %v5667_v48, %v2671_v32  ;;  %v2701_v62 = vadd.f32 %v5667_v48, %v2675_v7  ;;  %v2678_v34 = vmul.f32 %v5675_v36, %v2652_v28  ;;  %v2698_v1 = vadd.f32 %v5671_v2, %v2672_v53 }
 0x1f1   : > { %3023 = vmatpush.bf16.msra.mxu0 %v4731_v54  ;;  %v2702_v13 = vadd.f32 %v5671_v2, %v2676_v25  ;;  %v2699_v35 = vadd.f32 %v5682_v23, %v2673_v30  ;;  %v2703_v6 = vadd.f32 %v5682_v23, %v2677_v33  ;;  %v2700_v9 = vadd.f32 %v5698_v49, %v2674_v31 }
 0x1f2   : > { %3042 = vmatpush.bf16.msra.mxu1 %v4739_v41  ;;  %v2704_v10 = vadd.f32 %v5698_v49, %v2678_v34  ;;  %vm2713_vm8 = vcmp.ge.f32.partialorder %v2697_v56, 0.0  ;;  %vm2717_vm9 = vcmp.ge.f32.partialorder %v2701_v62, 0.0  ;;  %v2729_v48 = vmul.f32 0.1, %v2697_v56 }
 0x1f3   : > { %3061 = vmatpush.bf16.msra.mxu2 %v4747_v44  ;;  %v2733_v36 = vmul.f32 0.1, %v2701_v62  ;;  %vm2714_vm10 = vcmp.ge.f32.partialorder %v2698_v1, 0.0  ;;  %vm2718_vm11 = vcmp.ge.f32.partialorder %v2702_v13, 0.0  ;;  %v2730_v37 = vmul.f32 0.1, %v2698_v1 }
 0x1f4   : > { %3080 = vmatpush.bf16.msra.mxu3 %v4755_v51  ;;  %v2734_v38 = vmul.f32 0.1, %v2702_v13  ;;  %v2731_v14 = vmul.f32 0.1, %v2699_v35  ;;  %v2735_v2 = vmul.f32 0.1, %v2703_v6  ;;  %v2745_v23 = vsel %vm2713_vm8, %v2697_v56, %v2729_v48 }
 0x1f5   : > { %3024 = vmatpush.bf16.msra.mxu0 %v4730_v59  ;;  %v2732_v39 = vmul.f32 0.1, %v2700_v9  ;;  %v2736_v15 = vmul.f32 0.1, %v2704_v10  ;;  %vm2715_vm12 = vcmp.ge.f32.partialorder %v2699_v35, 0.0  ;;  %vm2719_vm13 = vcmp.ge.f32.partialorder %v2703_v6, 0.0 }
 0x1f6   : > { %3043 = vmatpush.bf16.msra.mxu1 %v4738_v19  ;;  %vm2716_vm14 = vcmp.ge.f32.partialorder %v2700_v9, 0.0  ;;  %vm2720_vm15 = vcmp.ge.f32.partialorder %v2704_v10, 0.0  ;;  %v2749_v49 = vsel %vm2717_vm9, %v2701_v62, %v2733_v36  ;;  %v2746_v54 = vsel %vm2714_vm10, %v2698_v1, %v2730_v37 }
 0x1f7   : > { %3062 = vmatpush.bf16.msra.mxu2 %v4746_v0  ;;  %v2750_v24 = vsel %vm2718_vm11, %v2702_v13, %v2734_v38  ;;  %v2747_v40 = vsel %vm2715_vm12, %v2699_v35, %v2731_v14  ;;  %v2751_v55 = vsel %vm2719_vm13, %v2703_v6, %v2735_v2  ;;  %v2748_v41 = vsel %vm2716_vm14, %v2700_v9, %v2732_v39 }
 0x1f8   : > { %3081 = vmatpush.bf16.msra.mxu3 %v4754_v3  ;;  %3025 = vmatmul.bf16.vlgmr.msra.gmra.mxu0 %v2753_v20  ;;  %v2752_v44 = vsel %vm2720_vm15, %v2704_v10, %v2736_v15  ;;  %v2757_v46 = vpack.c.bf16 %v2749_v49, %v2745_v23  ;;  %v2758_v47 = vpack.c.bf16 %v2750_v24, %v2746_v54 }
 0x1f9   : > { %3044 = vmatmul.bf16.vlgmr.msra.gmra.mxu1 %v2754_v21  ;;  %v2759_v45 = vpack.c.bf16 %v2751_v55, %v2747_v40  ;;  %v2760_v50 = vpack.c.bf16 %v2752_v44, %v2748_v41 }
 0x1fa   : > { %3063 = vmatmul.bf16.vlgmr.msra.gmra.mxu2 %v2755_v22 }
 0x1fb   : > { %3082 = vmatmul.bf16.vlgmr.msra.gmra.mxu3 %v2756_v29 }
 0x208   : > { %3030 = vmatmul.bf16.gmra.mxu0 %v2757_v46 }
 0x209   : > { %3049 = vmatmul.bf16.gmra.mxu1 %v2758_v47 }
 0x20a   : > { %3068 = vmatmul.bf16.gmra.mxu2 %v2759_v45 }
 0x20b   : > { %3087 = vmatmul.bf16.gmra.mxu3 %v2760_v50 }
 0x275   : > { %v3026_v51 = vpop.f32.mrf.mxu0 }
 0x276   : > { %v3045_v52 = vpop.f32.mrf.mxu1 }
 0x277   : > { %v3046_v57 = vadd.f32 %v3045_v52, %v3026_v51 }
 0x27d   : > { %v3064_v59 = vpop.f32.mrf.mxu2  ;;  %v3028_v18 = vpop.f32.mrf.mxu0 }
 0x27e   : > { %v3083_v60 = vpop.f32.mrf.mxu3  ;;  %v3065_v61 = vadd.f32 %v3064_v59, %v3046_v57  ;;  %v3047_v43 = vpop.f32.mrf.mxu1 }
 0x27f   : > { %v3048_v19 = vadd.f32 %v3047_v43, %v3028_v18 }
 0x280   : > { %v3084_v63 = vadd.f32 %v3083_v60, %v3065_v61 }
 0x282   : > { %3093 = vst [vmem:[%s4937_s9] sm:$0xff] %v3084_v63 }
 0x285   : > { %v3066_v16 = vpop.f32.mrf.mxu2  ;;  %v3031_v27 = vpop.f32.mrf.mxu0 }
 0x286   : > { %v3085_v17 = vpop.f32.mrf.mxu3  ;;  %v3067_v58 = vadd.f32 %v3066_v16, %v3048_v19  ;;  %v3050_v42 = vpop.f32.mrf.mxu1 }
 0x287   : > { %v3051_v3 = vadd.f32 %v3050_v42, %v3031_v27 }
 0x288   : > { %v3086_v0 = vadd.f32 %v3085_v17, %v3067_v58 }
 0x28a   : > { %3094 = vst [vmem:[%s4937_s9 + $0x8] sm:$0xff] %v3086_v0 }
 0x28d   : > { %v3069_v4 = vpop.f32.mrf.mxu2  ;;  %v3033_v32 = vpop.f32.mrf.mxu0 }
 0x28e   : > { %v3088_v26 = vpop.f32.mrf.mxu3  ;;  %v3070_v5 = vadd.f32 %v3069_v4, %v3051_v3  ;;  %v3052_v7 = vpop.f32.mrf.mxu1 }
 0x28f   : > { %v3053_v11 = vadd.f32 %v3052_v7, %v3033_v32 }
 0x290   : > { %v3089_v8 = vadd.f32 %v3088_v26, %v3070_v5 }
 0x292   : > { %3095 = vst [vmem:[%s4937_s9 + $0x10] sm:$0xff] %v3089_v8 }
 0x295   : > { %v3071_v12 = vpop.f32.mrf.mxu2 }
 0x296   : > { %v3072_v20 = vadd.f32 %v3071_v12, %v3053_v11  ;;  %v3090_v21 = vpop.f32.mrf.mxu3 }
 0x298   : > { %v3091_v53 = vadd.f32 %v3090_v21, %v3072_v20 }
 0x29a   : > { %3096 = vst [vmem:[%s4937_s9 + $0x18] sm:$0xff] %v3091_v53 }
 0x29b PF: > { %s15_s22 = sadd.s32 1, %s4842_s22   ;;  %s5764_s18 = smov %s4834_s20 }
 0x29c   : > { %p12_p9 = scmp.ge.s32.totalorder %s15_s22, 20   ;;  %s5765_s19 = smov %s4838_s21 }
 0x29d   : > { %s5766_s20 = smov %s5769_s23  ;;  %s5767_s21 = smov %s5773_s24 }
 0x29e   :  { %14 = sbr.rel (!%p12_p9) target bundleno = 3 (0x3), region = 90 }

</bundles_post_ra>
